<compile_context>
chip_gen: v5e
topology: v5e:2x2
jax: 0.10.0
libtpu: 0.0.40
codegen_flags: <defaults>
</compile_context>

<pallas_src>
import jax
import jax.numpy as jnp
from jax.experimental import pallas as pl
from jax.experimental.pallas import tpu as pltpu


# ----------------------------- fused kernel --------------------------------

def _make_fused_kernel(N, Hp, Wp, C0p, H1, W1, C1s, H2, W2):
    """Build the fused forward kernel for static geometry.

    N           batch
    Hp, Wp      spatial dims of the zero-padded conv1 input
    C0p         input channels padded to an 8-lane tap slot
    H1, W1      conv1 output spatial dims
    C1s         conv1 output channels padded to a 16-lane tap slot
    H2, W2      conv2 output spatial dims
    """
    H1p, W1p = H1 + 2, W1 + 2          # conv2 spatial zero-padding (pad=1)

    def kernel(x_ref, consts_ref, w1_ref, w2_ref, w3_ref, o_ref,
               p1_ref, vp1_ref, p2_ref):
        eps = 1e-5
        cv = consts_ref[...]                       # (8, 128): one vreg of constants
        b1 = cv[0:1, :]
        b2 = cv[1:2, :]
        gamma = cv[2:3, :32]
        beta = cv[3:4, :32]
        b3 = cv[4:5, :]

        # ---- conv1 im2col: strided VMEM reads -> (N*H1*W1, 4*C0p) patches ----
        # x_ref is (N*Hp*Wp, C0p): flattened (n, y, x) rows of the padded input.
        # conv1: kernel 2x2, stride 4, padding 1 (already applied).
        for n in range(N):
            for oy in range(H1):
                dst = (n * H1 + oy) * W1
                for ki in range(2):
                    for kj in range(2):
                        tap = ki * 2 + kj
                        src = (n * Hp + 4 * oy + ki) * Wp + kj
                        p1_ref[pl.ds(dst, W1), pl.ds(tap * C0p, C0p)] = (
                            x_ref[pl.ds(src, W1, 4), :])

        # ---- conv1: one MXU matmul + bias (output lanes padded to 128) ----
        v1 = jnp.dot(p1_ref[...], w1_ref[...],
                     preferred_element_type=jnp.float32) + b1      # (N*H1*W1, 128)

        # ---- zero-pad conv1 output spatially (pad=1) into VMEM scratch ----
        vp1_ref[...] = jnp.zeros_like(vp1_ref)
        for n in range(N):
            for oy in range(H1):
                dst = (n * H1p + oy + 1) * W1p + 1
                src = (n * H1 + oy) * W1
                vp1_ref[pl.ds(dst, W1), :] = v1[src:src + W1, :C1s]

        # ---- conv2 im2col: kernel 3x3, dilation 2, stride 2 -> (N*H2*W2, 9*C1s) ----
        for n in range(N):
            for oy in range(H2):
                dst = (n * H2 + oy) * W2
                for ki in range(3):
                    for kj in range(3):
                        tap = ki * 3 + kj
                        src = (n * H1p + 2 * oy + 2 * ki) * W1p + 2 * kj
                        p2_ref[pl.ds(dst, W2), pl.ds(tap * C1s, C1s)] = (
                            vp1_ref[pl.ds(src, W2, 2), :])

        # ---- conv2: one MXU matmul + bias ----
        v2 = jnp.dot(p2_ref[...], w2_ref[...],
                     preferred_element_type=jnp.float32) + b2      # (N*H2*W2, 128)

        # ---- LayerNorm1 (affine, 32 channels) ----
        x32 = v2[:, :32]
        mu = jnp.mean(x32, axis=-1, keepdims=True)
        var = jnp.mean((x32 - mu) ** 2, axis=-1, keepdims=True)
        v3 = (x32 - mu) * jax.lax.rsqrt(var + eps) * gamma + beta  # (rows, 32)

        # ---- conv3 (1x1) ----
        v4 = jnp.dot(v3, w3_ref[...],
                     preferred_element_type=jnp.float32) + b3      # (rows, 128)

        # ---- LayerNorm2 (no affine, 64 channels) ----
        x64 = v4[:, :64]
        mu2 = jnp.mean(x64, axis=-1, keepdims=True)
        var2 = jnp.mean((x64 - mu2) ** 2, axis=-1, keepdims=True)
        v5 = (x64 - mu2) * jax.lax.rsqrt(var2 + eps)

        # ---- v6..v13 (tanh-GELU core); tanh/rsqrt run on the idle EUP slot ----
        v6 = v5 * 0.5
        v8 = (v5 * v5 * v5) * 0.044715
        v10 = (v5 + v8) * 0.7978845608028654
        v13 = v6 * jnp.tanh(v10)                                   # (rows, 64)

        # ---- lane-dense (rows, 128) store; wrapper slices back to 64 channels ----
        o_ref[...] = jnp.concatenate([v13, jnp.zeros_like(v13)], axis=-1)

    return kernel


# ----------------------------- weight repacking ------------------------------

def _prep_weights(params):
    """Trace-time repack of weights/biases into 128-lane-aligned operands."""
    # conv1 (12, 6, 2, 2) -> (4 taps * 8-lane slot, 128): rows = tap*8 + c.
    w1 = jnp.transpose(params["w1"], (2, 3, 1, 0)).reshape(4, 6, 12)
    w1 = jnp.pad(w1, ((0, 0), (0, 2), (0, 0))).reshape(32, 12)
    w1p = jnp.pad(w1, ((0, 0), (0, 128 - 12)))
    # conv2 (32, 12, 3, 3) -> (9 taps * 16-lane slot, 128): rows = tap*16 + c.
    w2 = jnp.transpose(params["w2"], (2, 3, 1, 0)).reshape(9, 12, 32)
    w2 = jnp.pad(w2, ((0, 0), (0, 4), (0, 0))).reshape(144, 32)
    w2p = jnp.pad(w2, ((0, 0), (0, 128 - 32)))
    # conv3 1x1 (64, 32, 1, 1) -> (32, 128)
    w3p = jnp.pad(params["w3"].reshape(64, 32).T, ((0, 0), (0, 128 - 64)))
    # All small vectors folded into one (8, 128) vreg-sized constant block.
    consts = jnp.zeros((8, 128), jnp.float32)
    consts = consts.at[0, :12].set(params["b1"])
    consts = consts.at[1, :32].set(params["b2"])
    consts = consts.at[2, :32].set(params["ln1_gamma"])
    consts = consts.at[3, :32].set(params["ln1_beta"])
    consts = consts.at[4, :64].set(params["b3"])
    return w1p, w2p, w3p, consts


# --------------------------------- wrapper -----------------------------------

def model_forward(x_nchw, params):
    N, C, H, W = x_nchw.shape
    # conv1: k=2, stride=4, pad=1   /   conv2: k=3, stride=2, pad=1, dilation=2
    Hp, Wp = H + 2, W + 2
    H1, W1 = (Hp - 2) // 4 + 1, (Wp - 2) // 4 + 1
    H1p, W1p = H1 + 2, W1 + 2
    H2, W2 = (H1p - 5) // 2 + 1, (W1p - 5) // 2 + 1
    C0p = 8            # 6 input channels -> 8-lane tap slot
    C1s = 16           # 12 conv1-out channels -> 16-lane tap slot
    M1, M2 = N * H1 * W1, N * H2 * W2

    w1p, w2p, w3p, consts = _prep_weights(params)

    # Layout plumbing only: NCHW -> NHWC, zero-pad spatial(+channel), flatten rows.
    x = jnp.transpose(x_nchw, (0, 2, 3, 1))
    xp = jnp.pad(x, ((0, 0), (1, 1), (1, 1), (0, C0p - C)))
    x2d = xp.reshape(N * Hp * Wp, C0p)

    kernel = _make_fused_kernel(N, Hp, Wp, C0p, H1, W1, C1s, H2, W2)

    out = pl.pallas_call(
        kernel,
        out_shape=jax.ShapeDtypeStruct((M2, 128), jnp.float32),
        grid=(1,),
        in_specs=[
            pl.BlockSpec((N * Hp * Wp, C0p), lambda i: (0, 0)),   # padded input
            pl.BlockSpec((8, 128), lambda i: (0, 0)),             # consts vreg
            pl.BlockSpec((32, 128), lambda i: (0, 0)),            # conv1 weights
            pl.BlockSpec((144, 128), lambda i: (0, 0)),           # conv2 weights
            pl.BlockSpec((32, 128), lambda i: (0, 0)),            # conv3 weights
        ],
        out_specs=pl.BlockSpec((M2, 128), lambda i: (0, 0)),
        scratch_shapes=[
            pltpu.VMEM((M1, 4 * C0p), jnp.float32),               # conv1 patches
            pltpu.VMEM((N * H1p * W1p, C1s), jnp.float32),        # padded conv1 out
            pltpu.VMEM((M2, 9 * C1s), jnp.float32),               # conv2 patches
        ],
        compiler_params=pltpu.CompilerParams(
            dimension_semantics=("arbitrary",)),
    )(x2d, consts, w1p, w2p, w3p)

    v13 = out[:, :64].reshape(N, H2, W2, 64)                      # (n, oy, ox, C)
    return jnp.transpose(v13, (0, 3, 1, 2))                       # NHWC -> NCHW


# ----------------------- pure-JAX reference (for checking) -------------------

def _reference_forward(x_nchw, params):
    dn = ("NCHW", "OIHW", "NCHW")
    hi = jax.lax.Precision.HIGHEST

    def conv(x, w, b, stride, pad, dil):
        y = jax.lax.conv_general_dilated(
            x, w, (stride, stride), ((pad, pad), (pad, pad)),
            rhs_dilation=(dil, dil), dimension_numbers=dn, precision=hi)
        return y + b[None, :, None, None]

    def ln_c(x, gamma=None, beta=None):
        mu = jnp.mean(x, axis=1, keepdims=True)
        var = jnp.mean((x - mu) ** 2, axis=1, keepdims=True)
        y = (x - mu) * jax.lax.rsqrt(var + 1e-5)
        if gamma is not None:
            y = y * gamma[None, :, None, None] + beta[None, :, None, None]
        return y

    v1 = conv(x_nchw, params["w1"], params["b1"], 4, 1, 1)
    v2 = conv(v1, params["w2"], params["b2"], 2, 1, 2)
    v3 = ln_c(v2, params["ln1_gamma"], params["ln1_beta"])
    v4 = conv(v3, params["w3"], params["b3"], 1, 0, 1)
    v5 = ln_c(v4)
    return 0.5 * v5 * jnp.tanh(0.7978845608028654 * (v5 + 0.044715 * v5 ** 3))


# ----------------------------------- main ------------------------------------

if __name__ == "__main__":
    key = jax.random.PRNGKey(0)
    k = jax.random.split(key, 8)

    # 6 in-channels as the module requires; 16x16 spatial gives valid (positive)
    # output sizes through the dilated/strided conv chain.
    x1 = jax.random.normal(k[0], (2, 6, 16, 16), jnp.float32)

    params = {
        # PyTorch weight layout (O, C, kh, kw); deterministic synthetic init.
        "w1": 0.1 * jax.random.normal(k[1], (12, 6, 2, 2), jnp.float32),
        "b1": 0.1 * jax.random.normal(k[2], (12,), jnp.float32),
        "w2": 0.1 * jax.random.normal(k[3], (32, 12, 3, 3), jnp.float32),
        "b2": 0.1 * jax.random.normal(k[4], (32,), jnp.float32),
        "ln1_gamma": jnp.ones((32,), jnp.float32),                # PyTorch default
        "ln1_beta": jnp.zeros((32,), jnp.float32),                # PyTorch default
        "w3": 0.1 * jax.random.normal(k[5], (64, 32, 1, 1), jnp.float32),
        "b3": 0.1 * jax.random.normal(k[6], (64,), jnp.float32),
    }

    out = jax.jit(model_forward)(x1, params)
    jax.block_until_ready(out)
    assert out.shape == (2, 64, 2, 2) and out.dtype == jnp.float32

    ref = _reference_forward(x1, params)
    max_diff = float(jnp.max(jnp.abs(out - ref)))
    assert jnp.allclose(out, ref, rtol=2e-2, atol=2e-2), f"max_diff={max_diff}"

    print("KERNEL_OK")
</pallas_src>

<mosaic_0001>
module attributes {stable_mosaic.version = 11 : i64} {
  func.func @kernel(%arg0: i32, %arg1: memref<648x8xf32, #tpu.memory_space<vmem>>, %arg2: memref<8x128xf32, #tpu.memory_space<vmem>>, %arg3: memref<32x128xf32, #tpu.memory_space<vmem>>, %arg4: memref<144x128xf32, #tpu.memory_space<vmem>>, %arg5: memref<32x128xf32, #tpu.memory_space<vmem>>, %arg6: memref<8x128xf32, #tpu.memory_space<vmem>>, %arg7: memref<50x32xf32, #tpu.memory_space<vmem>>, %arg8: memref<98x16xf32, #tpu.memory_space<vmem>>, %arg9: memref<8x144xf32, #tpu.memory_space<vmem>>) attributes {dimension_semantics = [#tpu.dimension_semantics<arbitrary>], iteration_bounds = array<i64: 1>, scalar_prefetch = 0 : i64, scratch_operands = 3 : i64, tpu.core_type = #tpu.core_type<tc>, window_params = [{pipeline_mode = #tpu.pipeline_mode<synchronous>, transform_indices = @transform_0, window_bounds = array<i64: 648, 8>}, {pipeline_mode = #tpu.pipeline_mode<synchronous>, transform_indices = @transform_1, window_bounds = array<i64: 8, 128>}, {pipeline_mode = #tpu.pipeline_mode<synchronous>, transform_indices = @transform_2, window_bounds = array<i64: 32, 128>}, {pipeline_mode = #tpu.pipeline_mode<synchronous>, transform_indices = @transform_3, window_bounds = array<i64: 144, 128>}, {pipeline_mode = #tpu.pipeline_mode<synchronous>, transform_indices = @transform_4, window_bounds = array<i64: 32, 128>}, {pipeline_mode = #tpu.pipeline_mode<synchronous>, transform_indices = @transform_5, window_bounds = array<i64: 8, 128>}]} {
    %c0 = arith.constant 0 : index
    %c0_0 = arith.constant 0 : index
    %0 = vector.load %arg2[%c0, %c0_0] : memref<8x128xf32, #tpu.memory_space<vmem>>, vector<8x128xf32>
    %1 = vector.extract_strided_slice %0 {offsets = [0, 0], sizes = [1, 128], strides = [1, 1]} : vector<8x128xf32> to vector<1x128xf32>
    %2 = vector.extract_strided_slice %0 {offsets = [1, 0], sizes = [1, 128], strides = [1, 1]} : vector<8x128xf32> to vector<1x128xf32>
    %3 = vector.extract_strided_slice %0 {offsets = [2, 0], sizes = [1, 32], strides = [1, 1]} : vector<8x128xf32> to vector<1x32xf32>
    %4 = vector.extract_strided_slice %0 {offsets = [3, 0], sizes = [1, 32], strides = [1, 1]} : vector<8x128xf32> to vector<1x32xf32>
    %5 = vector.extract_strided_slice %0 {offsets = [4, 0], sizes = [1, 128], strides = [1, 1]} : vector<8x128xf32> to vector<1x128xf32>
    %c0_1 = arith.constant 0 : index
    %c0_2 = arith.constant 0 : index
    %6 = tpu.strided_load %arg1[%c0_1, %c0_2] {strides = array<i32: 4, 1>} : memref<648x8xf32, #tpu.memory_space<vmem>>, vector<5x8xf32>
    %c0_3 = arith.constant 0 : index
    %c0_4 = arith.constant 0 : index
    %7 = vector.load %arg7[%c0_3, %c0_4] : memref<50x32xf32, #tpu.memory_space<vmem>>, vector<5x8xf32>
    tpu.vector_store %arg7[%c0_3, %c0_4], %6 {strides = array<i32>} : memref<50x32xf32, #tpu.memory_space<vmem>>, vector<5x8xf32>,
    %c1 = arith.constant 1 : index
    %c0_5 = arith.constant 0 : index
    %8 = tpu.strided_load %arg1[%c1, %c0_5] {strides = array<i32: 4, 1>} : memref<648x8xf32, #tpu.memory_space<vmem>>, vector<5x8xf32>
    %c0_6 = arith.constant 0 : index
    %c8 = arith.constant 8 : index
    %9 = vector.load %arg7[%c0_6, %c8] : memref<50x32xf32, #tpu.memory_space<vmem>>, vector<5x8xf32>
    tpu.vector_store %arg7[%c0_6, %c8], %8 {strides = array<i32>} : memref<50x32xf32, #tpu.memory_space<vmem>>, vector<5x8xf32>,
    %c18 = arith.constant 18 : index
    %c0_7 = arith.constant 0 : index
    %10 = tpu.strided_load %arg1[%c18, %c0_7] {strides = array<i32: 4, 1>} : memref<648x8xf32, #tpu.memory_space<vmem>>, vector<5x8xf32>
    %c0_8 = arith.constant 0 : index
    %c16 = arith.constant 16 : index
    %11 = vector.load %arg7[%c0_8, %c16] : memref<50x32xf32, #tpu.memory_space<vmem>>, vector<5x8xf32>
    tpu.vector_store %arg7[%c0_8, %c16], %10 {strides = array<i32>} : memref<50x32xf32, #tpu.memory_space<vmem>>, vector<5x8xf32>,
    %c19 = arith.constant 19 : index
    %c0_9 = arith.constant 0 : index
    %12 = tpu.strided_load %arg1[%c19, %c0_9] {strides = array<i32: 4, 1>} : memref<648x8xf32, #tpu.memory_space<vmem>>, vector<5x8xf32>
    %c0_10 = arith.constant 0 : index
    %c24 = arith.constant 24 : index
    %13 = vector.load %arg7[%c0_10, %c24] : memref<50x32xf32, #tpu.memory_space<vmem>>, vector<5x8xf32>
    tpu.vector_store %arg7[%c0_10, %c24], %12 {strides = array<i32>} : memref<50x32xf32, #tpu.memory_space<vmem>>, vector<5x8xf32>,
    %c72 = arith.constant 72 : index
    %c0_11 = arith.constant 0 : index
    %14 = tpu.strided_load %arg1[%c72, %c0_11] {strides = array<i32: 4, 1>} : memref<648x8xf32, #tpu.memory_space<vmem>>, vector<5x8xf32>
    %c5 = arith.constant 5 : index
    %c0_12 = arith.constant 0 : index
    %15 = vector.load %arg7[%c5, %c0_12] : memref<50x32xf32, #tpu.memory_space<vmem>>, vector<5x8xf32>
    tpu.vector_store %arg7[%c5, %c0_12], %14 {strides = array<i32>} : memref<50x32xf32, #tpu.memory_space<vmem>>, vector<5x8xf32>,
    %c73 = arith.constant 73 : index
    %c0_13 = arith.constant 0 : index
    %16 = tpu.strided_load %arg1[%c73, %c0_13] {strides = array<i32: 4, 1>} : memref<648x8xf32, #tpu.memory_space<vmem>>, vector<5x8xf32>
    %c5_14 = arith.constant 5 : index
    %c8_15 = arith.constant 8 : index
    %17 = vector.load %arg7[%c5_14, %c8_15] : memref<50x32xf32, #tpu.memory_space<vmem>>, vector<5x8xf32>
    tpu.vector_store %arg7[%c5_14, %c8_15], %16 {strides = array<i32>} : memref<50x32xf32, #tpu.memory_space<vmem>>, vector<5x8xf32>,
    %c90 = arith.constant 90 : index
    %c0_16 = arith.constant 0 : index
    %18 = tpu.strided_load %arg1[%c90, %c0_16] {strides = array<i32: 4, 1>} : memref<648x8xf32, #tpu.memory_space<vmem>>, vector<5x8xf32>
    %c5_17 = arith.constant 5 : index
    %c16_18 = arith.constant 16 : index
    %19 = vector.load %arg7[%c5_17, %c16_18] : memref<50x32xf32, #tpu.memory_space<vmem>>, vector<5x8xf32>
    tpu.vector_store %arg7[%c5_17, %c16_18], %18 {strides = array<i32>} : memref<50x32xf32, #tpu.memory_space<vmem>>, vector<5x8xf32>,
    %c91 = arith.constant 91 : index
    %c0_19 = arith.constant 0 : index
    %20 = tpu.strided_load %arg1[%c91, %c0_19] {strides = array<i32: 4, 1>} : memref<648x8xf32, #tpu.memory_space<vmem>>, vector<5x8xf32>
    %c5_20 = arith.constant 5 : index
    %c24_21 = arith.constant 24 : index
    %21 = vector.load %arg7[%c5_20, %c24_21] : memref<50x32xf32, #tpu.memory_space<vmem>>, vector<5x8xf32>
    tpu.vector_store %arg7[%c5_20, %c24_21], %20 {strides = array<i32>} : memref<50x32xf32, #tpu.memory_space<vmem>>, vector<5x8xf32>,
    %c144 = arith.constant 144 : index
    %c0_22 = arith.constant 0 : index
    %22 = tpu.strided_load %arg1[%c144, %c0_22] {strides = array<i32: 4, 1>} : memref<648x8xf32, #tpu.memory_space<vmem>>, vector<5x8xf32>
    %c10 = arith.constant 10 : index
    %c0_23 = arith.constant 0 : index
    %23 = vector.load %arg7[%c10, %c0_23] : memref<50x32xf32, #tpu.memory_space<vmem>>, vector<5x8xf32>
    tpu.vector_store %arg7[%c10, %c0_23], %22 {strides = array<i32>} : memref<50x32xf32, #tpu.memory_space<vmem>>, vector<5x8xf32>,
    %c145 = arith.constant 145 : index
    %c0_24 = arith.constant 0 : index
    %24 = tpu.strided_load %arg1[%c145, %c0_24] {strides = array<i32: 4, 1>} : memref<648x8xf32, #tpu.memory_space<vmem>>, vector<5x8xf32>
    %c10_25 = arith.constant 10 : index
    %c8_26 = arith.constant 8 : index
    %25 = vector.load %arg7[%c10_25, %c8_26] : memref<50x32xf32, #tpu.memory_space<vmem>>, vector<5x8xf32>
    tpu.vector_store %arg7[%c10_25, %c8_26], %24 {strides = array<i32>} : memref<50x32xf32, #tpu.memory_space<vmem>>, vector<5x8xf32>,
    %c162 = arith.constant 162 : index
    %c0_27 = arith.constant 0 : index
    %26 = tpu.strided_load %arg1[%c162, %c0_27] {strides = array<i32: 4, 1>} : memref<648x8xf32, #tpu.memory_space<vmem>>, vector<5x8xf32>
    %c10_28 = arith.constant 10 : index
    %c16_29 = arith.constant 16 : index
    %27 = vector.load %arg7[%c10_28, %c16_29] : memref<50x32xf32, #tpu.memory_space<vmem>>, vector<5x8xf32>
    tpu.vector_store %arg7[%c10_28, %c16_29], %26 {strides = array<i32>} : memref<50x32xf32, #tpu.memory_space<vmem>>, vector<5x8xf32>,
    %c163 = arith.constant 163 : index
    %c0_30 = arith.constant 0 : index
    %28 = tpu.strided_load %arg1[%c163, %c0_30] {strides = array<i32: 4, 1>} : memref<648x8xf32, #tpu.memory_space<vmem>>, vector<5x8xf32>
    %c10_31 = arith.constant 10 : index
    %c24_32 = arith.constant 24 : index
    %29 = vector.load %arg7[%c10_31, %c24_32] : memref<50x32xf32, #tpu.memory_space<vmem>>, vector<5x8xf32>
    tpu.vector_store %arg7[%c10_31, %c24_32], %28 {strides = array<i32>} : memref<50x32xf32, #tpu.memory_space<vmem>>, vector<5x8xf32>,
    %c216 = arith.constant 216 : index
    %c0_33 = arith.constant 0 : index
    %30 = tpu.strided_load %arg1[%c216, %c0_33] {strides = array<i32: 4, 1>} : memref<648x8xf32, #tpu.memory_space<vmem>>, vector<5x8xf32>
    %c15 = arith.constant 15 : index
    %c0_34 = arith.constant 0 : index
    %31 = vector.load %arg7[%c15, %c0_34] : memref<50x32xf32, #tpu.memory_space<vmem>>, vector<5x8xf32>
    tpu.vector_store %arg7[%c15, %c0_34], %30 {strides = array<i32>} : memref<50x32xf32, #tpu.memory_space<vmem>>, vector<5x8xf32>,
    %c217 = arith.constant 217 : index
    %c0_35 = arith.constant 0 : index
    %32 = tpu.strided_load %arg1[%c217, %c0_35] {strides = array<i32: 4, 1>} : memref<648x8xf32, #tpu.memory_space<vmem>>, vector<5x8xf32>
    %c15_36 = arith.constant 15 : index
    %c8_37 = arith.constant 8 : index
    %33 = vector.load %arg7[%c15_36, %c8_37] : memref<50x32xf32, #tpu.memory_space<vmem>>, vector<5x8xf32>
    tpu.vector_store %arg7[%c15_36, %c8_37], %32 {strides = array<i32>} : memref<50x32xf32, #tpu.memory_space<vmem>>, vector<5x8xf32>,
    %c234 = arith.constant 234 : index
    %c0_38 = arith.constant 0 : index
    %34 = tpu.strided_load %arg1[%c234, %c0_38] {strides = array<i32: 4, 1>} : memref<648x8xf32, #tpu.memory_space<vmem>>, vector<5x8xf32>
    %c15_39 = arith.constant 15 : index
    %c16_40 = arith.constant 16 : index
    %35 = vector.load %arg7[%c15_39, %c16_40] : memref<50x32xf32, #tpu.memory_space<vmem>>, vector<5x8xf32>
    tpu.vector_store %arg7[%c15_39, %c16_40], %34 {strides = array<i32>} : memref<50x32xf32, #tpu.memory_space<vmem>>, vector<5x8xf32>,
    %c235 = arith.constant 235 : index
    %c0_41 = arith.constant 0 : index
    %36 = tpu.strided_load %arg1[%c235, %c0_41] {strides = array<i32: 4, 1>} : memref<648x8xf32, #tpu.memory_space<vmem>>, vector<5x8xf32>
    %c15_42 = arith.constant 15 : index
    %c24_43 = arith.constant 24 : index
    %37 = vector.load %arg7[%c15_42, %c24_43] : memref<50x32xf32, #tpu.memory_space<vmem>>, vector<5x8xf32>
    tpu.vector_store %arg7[%c15_42, %c24_43], %36 {strides = array<i32>} : memref<50x32xf32, #tpu.memory_space<vmem>>, vector<5x8xf32>,
    %c288 = arith.constant 288 : index
    %c0_44 = arith.constant 0 : index
    %38 = tpu.strided_load %arg1[%c288, %c0_44] {strides = array<i32: 4, 1>} : memref<648x8xf32, #tpu.memory_space<vmem>>, vector<5x8xf32>
    %c20 = arith.constant 20 : index
    %c0_45 = arith.constant 0 : index
    %39 = vector.load %arg7[%c20, %c0_45] : memref<50x32xf32, #tpu.memory_space<vmem>>, vector<5x8xf32>
    tpu.vector_store %arg7[%c20, %c0_45], %38 {strides = array<i32>} : memref<50x32xf32, #tpu.memory_space<vmem>>, vector<5x8xf32>,
    %c289 = arith.constant 289 : index
    %c0_46 = arith.constant 0 : index
    %40 = tpu.strided_load %arg1[%c289, %c0_46] {strides = array<i32: 4, 1>} : memref<648x8xf32, #tpu.memory_space<vmem>>, vector<5x8xf32>
    %c20_47 = arith.constant 20 : index
    %c8_48 = arith.constant 8 : index
    %41 = vector.load %arg7[%c20_47, %c8_48] : memref<50x32xf32, #tpu.memory_space<vmem>>, vector<5x8xf32>
    tpu.vector_store %arg7[%c20_47, %c8_48], %40 {strides = array<i32>} : memref<50x32xf32, #tpu.memory_space<vmem>>, vector<5x8xf32>,
    %c306 = arith.constant 306 : index
    %c0_49 = arith.constant 0 : index
    %42 = tpu.strided_load %arg1[%c306, %c0_49] {strides = array<i32: 4, 1>} : memref<648x8xf32, #tpu.memory_space<vmem>>, vector<5x8xf32>
    %c20_50 = arith.constant 20 : index
    %c16_51 = arith.constant 16 : index
    %43 = vector.load %arg7[%c20_50, %c16_51] : memref<50x32xf32, #tpu.memory_space<vmem>>, vector<5x8xf32>
    tpu.vector_store %arg7[%c20_50, %c16_51], %42 {strides = array<i32>} : memref<50x32xf32, #tpu.memory_space<vmem>>, vector<5x8xf32>,
    %c307 = arith.constant 307 : index
    %c0_52 = arith.constant 0 : index
    %44 = tpu.strided_load %arg1[%c307, %c0_52] {strides = array<i32: 4, 1>} : memref<648x8xf32, #tpu.memory_space<vmem>>, vector<5x8xf32>
    %c20_53 = arith.constant 20 : index
    %c24_54 = arith.constant 24 : index
    %45 = vector.load %arg7[%c20_53, %c24_54] : memref<50x32xf32, #tpu.memory_space<vmem>>, vector<5x8xf32>
    tpu.vector_store %arg7[%c20_53, %c24_54], %44 {strides = array<i32>} : memref<50x32xf32, #tpu.memory_space<vmem>>, vector<5x8xf32>,
    %c324 = arith.constant 324 : index
    %c0_55 = arith.constant 0 : index
    %46 = tpu.strided_load %arg1[%c324, %c0_55] {strides = array<i32: 4, 1>} : memref<648x8xf32, #tpu.memory_space<vmem>>, vector<5x8xf32>
    %c25 = arith.constant 25 : index
    %c0_56 = arith.constant 0 : index
    %47 = vector.load %arg7[%c25, %c0_56] : memref<50x32xf32, #tpu.memory_space<vmem>>, vector<5x8xf32>
    tpu.vector_store %arg7[%c25, %c0_56], %46 {strides = array<i32>} : memref<50x32xf32, #tpu.memory_space<vmem>>, vector<5x8xf32>,
    %c325 = arith.constant 325 : index
    %c0_57 = arith.constant 0 : index
    %48 = tpu.strided_load %arg1[%c325, %c0_57] {strides = array<i32: 4, 1>} : memref<648x8xf32, #tpu.memory_space<vmem>>, vector<5x8xf32>
    %c25_58 = arith.constant 25 : index
    %c8_59 = arith.constant 8 : index
    %49 = vector.load %arg7[%c25_58, %c8_59] : memref<50x32xf32, #tpu.memory_space<vmem>>, vector<5x8xf32>
    tpu.vector_store %arg7[%c25_58, %c8_59], %48 {strides = array<i32>} : memref<50x32xf32, #tpu.memory_space<vmem>>, vector<5x8xf32>,
    %c342 = arith.constant 342 : index
    %c0_60 = arith.constant 0 : index
    %50 = tpu.strided_load %arg1[%c342, %c0_60] {strides = array<i32: 4, 1>} : memref<648x8xf32, #tpu.memory_space<vmem>>, vector<5x8xf32>
    %c25_61 = arith.constant 25 : index
    %c16_62 = arith.constant 16 : index
    %51 = vector.load %arg7[%c25_61, %c16_62] : memref<50x32xf32, #tpu.memory_space<vmem>>, vector<5x8xf32>
    tpu.vector_store %arg7[%c25_61, %c16_62], %50 {strides = array<i32>} : memref<50x32xf32, #tpu.memory_space<vmem>>, vector<5x8xf32>,
    %c343 = arith.constant 343 : index
    %c0_63 = arith.constant 0 : index
    %52 = tpu.strided_load %arg1[%c343, %c0_63] {strides = array<i32: 4, 1>} : memref<648x8xf32, #tpu.memory_space<vmem>>, vector<5x8xf32>
    %c25_64 = arith.constant 25 : index
    %c24_65 = arith.constant 24 : index
    %53 = vector.load %arg7[%c25_64, %c24_65] : memref<50x32xf32, #tpu.memory_space<vmem>>, vector<5x8xf32>
    tpu.vector_store %arg7[%c25_64, %c24_65], %52 {strides = array<i32>} : memref<50x32xf32, #tpu.memory_space<vmem>>, vector<5x8xf32>,
    %c396 = arith.constant 396 : index
    %c0_66 = arith.constant 0 : index
    %54 = tpu.strided_load %arg1[%c396, %c0_66] {strides = array<i32: 4, 1>} : memref<648x8xf32, #tpu.memory_space<vmem>>, vector<5x8xf32>
    %c30 = arith.constant 30 : index
    %c0_67 = arith.constant 0 : index
    %55 = vector.load %arg7[%c30, %c0_67] : memref<50x32xf32, #tpu.memory_space<vmem>>, vector<5x8xf32>
    tpu.vector_store %arg7[%c30, %c0_67], %54 {strides = array<i32>} : memref<50x32xf32, #tpu.memory_space<vmem>>, vector<5x8xf32>,
    %c397 = arith.constant 397 : index
    %c0_68 = arith.constant 0 : index
    %56 = tpu.strided_load %arg1[%c397, %c0_68] {strides = array<i32: 4, 1>} : memref<648x8xf32, #tpu.memory_space<vmem>>, vector<5x8xf32>
    %c30_69 = arith.constant 30 : index
    %c8_70 = arith.constant 8 : index
    %57 = vector.load %arg7[%c30_69, %c8_70] : memref<50x32xf32, #tpu.memory_space<vmem>>, vector<5x8xf32>
    tpu.vector_store %arg7[%c30_69, %c8_70], %56 {strides = array<i32>} : memref<50x32xf32, #tpu.memory_space<vmem>>, vector<5x8xf32>,
    %c414 = arith.constant 414 : index
    %c0_71 = arith.constant 0 : index
    %58 = tpu.strided_load %arg1[%c414, %c0_71] {strides = array<i32: 4, 1>} : memref<648x8xf32, #tpu.memory_space<vmem>>, vector<5x8xf32>
    %c30_72 = arith.constant 30 : index
    %c16_73 = arith.constant 16 : index
    %59 = vector.load %arg7[%c30_72, %c16_73] : memref<50x32xf32, #tpu.memory_space<vmem>>, vector<5x8xf32>
    tpu.vector_store %arg7[%c30_72, %c16_73], %58 {strides = array<i32>} : memref<50x32xf32, #tpu.memory_space<vmem>>, vector<5x8xf32>,
    %c415 = arith.constant 415 : index
    %c0_74 = arith.constant 0 : index
    %60 = tpu.strided_load %arg1[%c415, %c0_74] {strides = array<i32: 4, 1>} : memref<648x8xf32, #tpu.memory_space<vmem>>, vector<5x8xf32>
    %c30_75 = arith.constant 30 : index
    %c24_76 = arith.constant 24 : index
    %61 = vector.load %arg7[%c30_75, %c24_76] : memref<50x32xf32, #tpu.memory_space<vmem>>, vector<5x8xf32>
    tpu.vector_store %arg7[%c30_75, %c24_76], %60 {strides = array<i32>} : memref<50x32xf32, #tpu.memory_space<vmem>>, vector<5x8xf32>,
    %c468 = arith.constant 468 : index
    %c0_77 = arith.constant 0 : index
    %62 = tpu.strided_load %arg1[%c468, %c0_77] {strides = array<i32: 4, 1>} : memref<648x8xf32, #tpu.memory_space<vmem>>, vector<5x8xf32>
    %c35 = arith.constant 35 : index
    %c0_78 = arith.constant 0 : index
    %63 = vector.load %arg7[%c35, %c0_78] : memref<50x32xf32, #tpu.memory_space<vmem>>, vector<5x8xf32>
    tpu.vector_store %arg7[%c35, %c0_78], %62 {strides = array<i32>} : memref<50x32xf32, #tpu.memory_space<vmem>>, vector<5x8xf32>,
    %c469 = arith.constant 469 : index
    %c0_79 = arith.constant 0 : index
    %64 = tpu.strided_load %arg1[%c469, %c0_79] {strides = array<i32: 4, 1>} : memref<648x8xf32, #tpu.memory_space<vmem>>, vector<5x8xf32>
    %c35_80 = arith.constant 35 : index
    %c8_81 = arith.constant 8 : index
    %65 = vector.load %arg7[%c35_80, %c8_81] : memref<50x32xf32, #tpu.memory_space<vmem>>, vector<5x8xf32>
    tpu.vector_store %arg7[%c35_80, %c8_81], %64 {strides = array<i32>} : memref<50x32xf32, #tpu.memory_space<vmem>>, vector<5x8xf32>,
    %c486 = arith.constant 486 : index
    %c0_82 = arith.constant 0 : index
    %66 = tpu.strided_load %arg1[%c486, %c0_82] {strides = array<i32: 4, 1>} : memref<648x8xf32, #tpu.memory_space<vmem>>, vector<5x8xf32>
    %c35_83 = arith.constant 35 : index
    %c16_84 = arith.constant 16 : index
    %67 = vector.load %arg7[%c35_83, %c16_84] : memref<50x32xf32, #tpu.memory_space<vmem>>, vector<5x8xf32>
    tpu.vector_store %arg7[%c35_83, %c16_84], %66 {strides = array<i32>} : memref<50x32xf32, #tpu.memory_space<vmem>>, vector<5x8xf32>,
    %c487 = arith.constant 487 : index
    %c0_85 = arith.constant 0 : index
    %68 = tpu.strided_load %arg1[%c487, %c0_85] {strides = array<i32: 4, 1>} : memref<648x8xf32, #tpu.memory_space<vmem>>, vector<5x8xf32>
    %c35_86 = arith.constant 35 : index
    %c24_87 = arith.constant 24 : index
    %69 = vector.load %arg7[%c35_86, %c24_87] : memref<50x32xf32, #tpu.memory_space<vmem>>, vector<5x8xf32>
    tpu.vector_store %arg7[%c35_86, %c24_87], %68 {strides = array<i32>} : memref<50x32xf32, #tpu.memory_space<vmem>>, vector<5x8xf32>,
    %c540 = arith.constant 540 : index
    %c0_88 = arith.constant 0 : index
    %70 = tpu.strided_load %arg1[%c540, %c0_88] {strides = array<i32: 4, 1>} : memref<648x8xf32, #tpu.memory_space<vmem>>, vector<5x8xf32>
    %c40 = arith.constant 40 : index
    %c0_89 = arith.constant 0 : index
    %71 = vector.load %arg7[%c40, %c0_89] : memref<50x32xf32, #tpu.memory_space<vmem>>, vector<5x8xf32>
    tpu.vector_store %arg7[%c40, %c0_89], %70 {strides = array<i32>} : memref<50x32xf32, #tpu.memory_space<vmem>>, vector<5x8xf32>,
    %c541 = arith.constant 541 : index
    %c0_90 = arith.constant 0 : index
    %72 = tpu.strided_load %arg1[%c541, %c0_90] {strides = array<i32: 4, 1>} : memref<648x8xf32, #tpu.memory_space<vmem>>, vector<5x8xf32>
    %c40_91 = arith.constant 40 : index
    %c8_92 = arith.constant 8 : index
    %73 = vector.load %arg7[%c40_91, %c8_92] : memref<50x32xf32, #tpu.memory_space<vmem>>, vector<5x8xf32>
    tpu.vector_store %arg7[%c40_91, %c8_92], %72 {strides = array<i32>} : memref<50x32xf32, #tpu.memory_space<vmem>>, vector<5x8xf32>,
    %c558 = arith.constant 558 : index
    %c0_93 = arith.constant 0 : index
    %74 = tpu.strided_load %arg1[%c558, %c0_93] {strides = array<i32: 4, 1>} : memref<648x8xf32, #tpu.memory_space<vmem>>, vector<5x8xf32>
    %c40_94 = arith.constant 40 : index
    %c16_95 = arith.constant 16 : index
    %75 = vector.load %arg7[%c40_94, %c16_95] : memref<50x32xf32, #tpu.memory_space<vmem>>, vector<5x8xf32>
    tpu.vector_store %arg7[%c40_94, %c16_95], %74 {strides = array<i32>} : memref<50x32xf32, #tpu.memory_space<vmem>>, vector<5x8xf32>,
    %c559 = arith.constant 559 : index
    %c0_96 = arith.constant 0 : index
    %76 = tpu.strided_load %arg1[%c559, %c0_96] {strides = array<i32: 4, 1>} : memref<648x8xf32, #tpu.memory_space<vmem>>, vector<5x8xf32>
    %c40_97 = arith.constant 40 : index
    %c24_98 = arith.constant 24 : index
    %77 = vector.load %arg7[%c40_97, %c24_98] : memref<50x32xf32, #tpu.memory_space<vmem>>, vector<5x8xf32>
    tpu.vector_store %arg7[%c40_97, %c24_98], %76 {strides = array<i32>} : memref<50x32xf32, #tpu.memory_space<vmem>>, vector<5x8xf32>,
    %c612 = arith.constant 612 : index
    %c0_99 = arith.constant 0 : index
    %78 = tpu.strided_load %arg1[%c612, %c0_99] {strides = array<i32: 4, 1>} : memref<648x8xf32, #tpu.memory_space<vmem>>, vector<5x8xf32>
    %c45 = arith.constant 45 : index
    %c0_100 = arith.constant 0 : index
    %79 = vector.load %arg7[%c45, %c0_100] : memref<50x32xf32, #tpu.memory_space<vmem>>, vector<5x8xf32>
    tpu.vector_store %arg7[%c45, %c0_100], %78 {strides = array<i32>} : memref<50x32xf32, #tpu.memory_space<vmem>>, vector<5x8xf32>,
    %c613 = arith.constant 613 : index
    %c0_101 = arith.constant 0 : index
    %80 = tpu.strided_load %arg1[%c613, %c0_101] {strides = array<i32: 4, 1>} : memref<648x8xf32, #tpu.memory_space<vmem>>, vector<5x8xf32>
    %c45_102 = arith.constant 45 : index
    %c8_103 = arith.constant 8 : index
    %81 = vector.load %arg7[%c45_102, %c8_103] : memref<50x32xf32, #tpu.memory_space<vmem>>, vector<5x8xf32>
    tpu.vector_store %arg7[%c45_102, %c8_103], %80 {strides = array<i32>} : memref<50x32xf32, #tpu.memory_space<vmem>>, vector<5x8xf32>,
    %c630 = arith.constant 630 : index
    %c0_104 = arith.constant 0 : index
    %82 = tpu.strided_load %arg1[%c630, %c0_104] {strides = array<i32: 4, 1>} : memref<648x8xf32, #tpu.memory_space<vmem>>, vector<5x8xf32>
    %c45_105 = arith.constant 45 : index
    %c16_106 = arith.constant 16 : index
    %83 = vector.load %arg7[%c45_105, %c16_106] : memref<50x32xf32, #tpu.memory_space<vmem>>, vector<5x8xf32>
    tpu.vector_store %arg7[%c45_105, %c16_106], %82 {strides = array<i32>} : memref<50x32xf32, #tpu.memory_space<vmem>>, vector<5x8xf32>,
    %c631 = arith.constant 631 : index
    %c0_107 = arith.constant 0 : index
    %84 = tpu.strided_load %arg1[%c631, %c0_107] {strides = array<i32: 4, 1>} : memref<648x8xf32, #tpu.memory_space<vmem>>, vector<5x8xf32>
    %c45_108 = arith.constant 45 : index
    %c24_109 = arith.constant 24 : index
    %85 = vector.load %arg7[%c45_108, %c24_109] : memref<50x32xf32, #tpu.memory_space<vmem>>, vector<5x8xf32>
    tpu.vector_store %arg7[%c45_108, %c24_109], %84 {strides = array<i32>} : memref<50x32xf32, #tpu.memory_space<vmem>>, vector<5x8xf32>,
    %c0_110 = arith.constant 0 : index
    %c0_111 = arith.constant 0 : index
    %86 = vector.load %arg7[%c0_110, %c0_111] : memref<50x32xf32, #tpu.memory_space<vmem>>, vector<50x32xf32>
    %c0_112 = arith.constant 0 : index
    %c0_113 = arith.constant 0 : index
    %87 = vector.load %arg3[%c0_112, %c0_113] : memref<32x128xf32, #tpu.memory_space<vmem>>, vector<32x128xf32>
    %cst = arith.constant dense<0.000000e+00> : vector<50x128xf32>
    %88 = tpu.matmul %86, %87, %cst {dimension_numbers = #tpu.dot_dimension_numbers<[1], [0], [0], [1], [0, 0, 1, 1], [], []>} : vector<50x32xf32>, vector<32x128xf32>, vector<50x128xf32> -> vector<50x128xf32>
    %89 = vector.broadcast %1 : vector<1x128xf32> to vector<50x128xf32>
    %90 = arith.addf %88, %89 : vector<50x128xf32>
    %cst_114 = arith.constant 0.000000e+00 : f32
    %91 = vector.broadcast %cst_114 : f32 to vector<98x16xf32>
    %c0_115 = arith.constant 0 : index
    %c0_116 = arith.constant 0 : index
    %92 = vector.load %arg8[%c0_115, %c0_116] : memref<98x16xf32, #tpu.memory_space<vmem>>, vector<98x16xf32>
    tpu.vector_store %arg8[%c0_115, %c0_116], %91 {strides = array<i32>} : memref<98x16xf32, #tpu.memory_space<vmem>>, vector<98x16xf32>,
    %93 = vector.extract_strided_slice %90 {offsets = [0, 0], sizes = [5, 16], strides = [1, 1]} : vector<50x128xf32> to vector<5x16xf32>
    %c8_117 = arith.constant 8 : index
    %c0_118 = arith.constant 0 : index
    %94 = vector.load %arg8[%c8_117, %c0_118] : memref<98x16xf32, #tpu.memory_space<vmem>>, vector<5x16xf32>
    tpu.vector_store %arg8[%c8_117, %c0_118], %93 {strides = array<i32>} : memref<98x16xf32, #tpu.memory_space<vmem>>, vector<5x16xf32>,
    %95 = vector.extract_strided_slice %90 {offsets = [5, 0], sizes = [5, 16], strides = [1, 1]} : vector<50x128xf32> to vector<5x16xf32>
    %c15_119 = arith.constant 15 : index
    %c0_120 = arith.constant 0 : index
    %96 = vector.load %arg8[%c15_119, %c0_120] : memref<98x16xf32, #tpu.memory_space<vmem>>, vector<5x16xf32>
    tpu.vector_store %arg8[%c15_119, %c0_120], %95 {strides = array<i32>} : memref<98x16xf32, #tpu.memory_space<vmem>>, vector<5x16xf32>,
    %97 = vector.extract_strided_slice %90 {offsets = [10, 0], sizes = [5, 16], strides = [1, 1]} : vector<50x128xf32> to vector<5x16xf32>
    %c22 = arith.constant 22 : index
    %c0_121 = arith.constant 0 : index
    %98 = vector.load %arg8[%c22, %c0_121] : memref<98x16xf32, #tpu.memory_space<vmem>>, vector<5x16xf32>
    tpu.vector_store %arg8[%c22, %c0_121], %97 {strides = array<i32>} : memref<98x16xf32, #tpu.memory_space<vmem>>, vector<5x16xf32>,
    %99 = vector.extract_strided_slice %90 {offsets = [15, 0], sizes = [5, 16], strides = [1, 1]} : vector<50x128xf32> to vector<5x16xf32>
    %c29 = arith.constant 29 : index
    %c0_122 = arith.constant 0 : index
    %100 = vector.load %arg8[%c29, %c0_122] : memref<98x16xf32, #tpu.memory_space<vmem>>, vector<5x16xf32>
    tpu.vector_store %arg8[%c29, %c0_122], %99 {strides = array<i32>} : memref<98x16xf32, #tpu.memory_space<vmem>>, vector<5x16xf32>,
    %101 = vector.extract_strided_slice %90 {offsets = [20, 0], sizes = [5, 16], strides = [1, 1]} : vector<50x128xf32> to vector<5x16xf32>
    %c36 = arith.constant 36 : index
    %c0_123 = arith.constant 0 : index
    %102 = vector.load %arg8[%c36, %c0_123] : memref<98x16xf32, #tpu.memory_space<vmem>>, vector<5x16xf32>
    tpu.vector_store %arg8[%c36, %c0_123], %101 {strides = array<i32>} : memref<98x16xf32, #tpu.memory_space<vmem>>, vector<5x16xf32>,
    %103 = vector.extract_strided_slice %90 {offsets = [25, 0], sizes = [5, 16], strides = [1, 1]} : vector<50x128xf32> to vector<5x16xf32>
    %c57 = arith.constant 57 : index
    %c0_124 = arith.constant 0 : index
    %104 = vector.load %arg8[%c57, %c0_124] : memref<98x16xf32, #tpu.memory_space<vmem>>, vector<5x16xf32>
    tpu.vector_store %arg8[%c57, %c0_124], %103 {strides = array<i32>} : memref<98x16xf32, #tpu.memory_space<vmem>>, vector<5x16xf32>,
    %105 = vector.extract_strided_slice %90 {offsets = [30, 0], sizes = [5, 16], strides = [1, 1]} : vector<50x128xf32> to vector<5x16xf32>
    %c64 = arith.constant 64 : index
    %c0_125 = arith.constant 0 : index
    %106 = vector.load %arg8[%c64, %c0_125] : memref<98x16xf32, #tpu.memory_space<vmem>>, vector<5x16xf32>
    tpu.vector_store %arg8[%c64, %c0_125], %105 {strides = array<i32>} : memref<98x16xf32, #tpu.memory_space<vmem>>, vector<5x16xf32>,
    %107 = vector.extract_strided_slice %90 {offsets = [35, 0], sizes = [5, 16], strides = [1, 1]} : vector<50x128xf32> to vector<5x16xf32>
    %c71 = arith.constant 71 : index
    %c0_126 = arith.constant 0 : index
    %108 = vector.load %arg8[%c71, %c0_126] : memref<98x16xf32, #tpu.memory_space<vmem>>, vector<5x16xf32>
    tpu.vector_store %arg8[%c71, %c0_126], %107 {strides = array<i32>} : memref<98x16xf32, #tpu.memory_space<vmem>>, vector<5x16xf32>,
    %109 = vector.extract_strided_slice %90 {offsets = [40, 0], sizes = [5, 16], strides = [1, 1]} : vector<50x128xf32> to vector<5x16xf32>
    %c78 = arith.constant 78 : index
    %c0_127 = arith.constant 0 : index
    %110 = vector.load %arg8[%c78, %c0_127] : memref<98x16xf32, #tpu.memory_space<vmem>>, vector<5x16xf32>
    tpu.vector_store %arg8[%c78, %c0_127], %109 {strides = array<i32>} : memref<98x16xf32, #tpu.memory_space<vmem>>, vector<5x16xf32>,
    %111 = vector.extract_strided_slice %90 {offsets = [45, 0], sizes = [5, 16], strides = [1, 1]} : vector<50x128xf32> to vector<5x16xf32>
    %c85 = arith.constant 85 : index
    %c0_128 = arith.constant 0 : index
    %112 = vector.load %arg8[%c85, %c0_128] : memref<98x16xf32, #tpu.memory_space<vmem>>, vector<5x16xf32>
    tpu.vector_store %arg8[%c85, %c0_128], %111 {strides = array<i32>} : memref<98x16xf32, #tpu.memory_space<vmem>>, vector<5x16xf32>,
    %c0_129 = arith.constant 0 : index
    %c0_130 = arith.constant 0 : index
    %113 = tpu.strided_load %arg8[%c0_129, %c0_130] {strides = array<i32: 2, 1>} : memref<98x16xf32, #tpu.memory_space<vmem>>, vector<2x16xf32>
    %c0_131 = arith.constant 0 : index
    %c0_132 = arith.constant 0 : index
    %114 = vector.load %arg9[%c0_131, %c0_132] : memref<8x144xf32, #tpu.memory_space<vmem>>, vector<2x16xf32>
    tpu.vector_store %arg9[%c0_131, %c0_132], %113 {strides = array<i32>} : memref<8x144xf32, #tpu.memory_space<vmem>>, vector<2x16xf32>,
    %c2 = arith.constant 2 : index
    %c0_133 = arith.constant 0 : index
    %115 = tpu.strided_load %arg8[%c2, %c0_133] {strides = array<i32: 2, 1>} : memref<98x16xf32, #tpu.memory_space<vmem>>, vector<2x16xf32>
    %c0_134 = arith.constant 0 : index
    %c16_135 = arith.constant 16 : index
    %116 = vector.load %arg9[%c0_134, %c16_135] : memref<8x144xf32, #tpu.memory_space<vmem>>, vector<2x16xf32>
    tpu.vector_store %arg9[%c0_134, %c16_135], %115 {strides = array<i32>} : memref<8x144xf32, #tpu.memory_space<vmem>>, vector<2x16xf32>,
    %c4 = arith.constant 4 : index
    %c0_136 = arith.constant 0 : index
    %117 = tpu.strided_load %arg8[%c4, %c0_136] {strides = array<i32: 2, 1>} : memref<98x16xf32, #tpu.memory_space<vmem>>, vector<2x16xf32>
    %c0_137 = arith.constant 0 : index
    %c32 = arith.constant 32 : index
    %118 = vector.load %arg9[%c0_137, %c32] : memref<8x144xf32, #tpu.memory_space<vmem>>, vector<2x16xf32>
    tpu.vector_store %arg9[%c0_137, %c32], %117 {strides = array<i32>} : memref<8x144xf32, #tpu.memory_space<vmem>>, vector<2x16xf32>,
    %c14 = arith.constant 14 : index
    %c0_138 = arith.constant 0 : index
    %119 = tpu.strided_load %arg8[%c14, %c0_138] {strides = array<i32: 2, 1>} : memref<98x16xf32, #tpu.memory_space<vmem>>, vector<2x16xf32>
    %c0_139 = arith.constant 0 : index
    %c48 = arith.constant 48 : index
    %120 = vector.load %arg9[%c0_139, %c48] : memref<8x144xf32, #tpu.memory_space<vmem>>, vector<2x16xf32>
    tpu.vector_store %arg9[%c0_139, %c48], %119 {strides = array<i32>} : memref<8x144xf32, #tpu.memory_space<vmem>>, vector<2x16xf32>,
    %c16_140 = arith.constant 16 : index
    %c0_141 = arith.constant 0 : index
    %121 = tpu.strided_load %arg8[%c16_140, %c0_141] {strides = array<i32: 2, 1>} : memref<98x16xf32, #tpu.memory_space<vmem>>, vector<2x16xf32>
    %c0_142 = arith.constant 0 : index
    %c64_143 = arith.constant 64 : index
    %122 = vector.load %arg9[%c0_142, %c64_143] : memref<8x144xf32, #tpu.memory_space<vmem>>, vector<2x16xf32>
    tpu.vector_store %arg9[%c0_142, %c64_143], %121 {strides = array<i32>} : memref<8x144xf32, #tpu.memory_space<vmem>>, vector<2x16xf32>,
    %c18_144 = arith.constant 18 : index
    %c0_145 = arith.constant 0 : index
    %123 = tpu.strided_load %arg8[%c18_144, %c0_145] {strides = array<i32: 2, 1>} : memref<98x16xf32, #tpu.memory_space<vmem>>, vector<2x16xf32>
    %c0_146 = arith.constant 0 : index
    %c80 = arith.constant 80 : index
    %124 = vector.load %arg9[%c0_146, %c80] : memref<8x144xf32, #tpu.memory_space<vmem>>, vector<2x16xf32>
    tpu.vector_store %arg9[%c0_146, %c80], %123 {strides = array<i32>} : memref<8x144xf32, #tpu.memory_space<vmem>>, vector<2x16xf32>,
    %c28 = arith.constant 28 : index
    %c0_147 = arith.constant 0 : index
    %125 = tpu.strided_load %arg8[%c28, %c0_147] {strides = array<i32: 2, 1>} : memref<98x16xf32, #tpu.memory_space<vmem>>, vector<2x16xf32>
    %c0_148 = arith.constant 0 : index
    %c96 = arith.constant 96 : index
    %126 = vector.load %arg9[%c0_148, %c96] : memref<8x144xf32, #tpu.memory_space<vmem>>, vector<2x16xf32>
    tpu.vector_store %arg9[%c0_148, %c96], %125 {strides = array<i32>} : memref<8x144xf32, #tpu.memory_space<vmem>>, vector<2x16xf32>,
    %c30_149 = arith.constant 30 : index
    %c0_150 = arith.constant 0 : index
    %127 = tpu.strided_load %arg8[%c30_149, %c0_150] {strides = array<i32: 2, 1>} : memref<98x16xf32, #tpu.memory_space<vmem>>, vector<2x16xf32>
    %c0_151 = arith.constant 0 : index
    %c112 = arith.constant 112 : index
    %128 = vector.load %arg9[%c0_151, %c112] : memref<8x144xf32, #tpu.memory_space<vmem>>, vector<2x16xf32>
    tpu.vector_store %arg9[%c0_151, %c112], %127 {strides = array<i32>} : memref<8x144xf32, #tpu.memory_space<vmem>>, vector<2x16xf32>,
    %c32_152 = arith.constant 32 : index
    %c0_153 = arith.constant 0 : index
    %129 = tpu.strided_load %arg8[%c32_152, %c0_153] {strides = array<i32: 2, 1>} : memref<98x16xf32, #tpu.memory_space<vmem>>, vector<2x16xf32>
    %c0_154 = arith.constant 0 : index
    %c128 = arith.constant 128 : index
    %130 = vector.load %arg9[%c0_154, %c128] : memref<8x144xf32, #tpu.memory_space<vmem>>, vector<2x16xf32>
    tpu.vector_store %arg9[%c0_154, %c128], %129 {strides = array<i32>} : memref<8x144xf32, #tpu.memory_space<vmem>>, vector<2x16xf32>,
    %c14_155 = arith.constant 14 : index
    %c0_156 = arith.constant 0 : index
    %131 = tpu.strided_load %arg8[%c14_155, %c0_156] {strides = array<i32: 2, 1>} : memref<98x16xf32, #tpu.memory_space<vmem>>, vector<2x16xf32>
    %c2_157 = arith.constant 2 : index
    %c0_158 = arith.constant 0 : index
    %132 = vector.load %arg9[%c2_157, %c0_158] : memref<8x144xf32, #tpu.memory_space<vmem>>, vector<2x16xf32>
    tpu.vector_store %arg9[%c2_157, %c0_158], %131 {strides = array<i32>} : memref<8x144xf32, #tpu.memory_space<vmem>>, vector<2x16xf32>,
    %c16_159 = arith.constant 16 : index
    %c0_160 = arith.constant 0 : index
    %133 = tpu.strided_load %arg8[%c16_159, %c0_160] {strides = array<i32: 2, 1>} : memref<98x16xf32, #tpu.memory_space<vmem>>, vector<2x16xf32>
    %c2_161 = arith.constant 2 : index
    %c16_162 = arith.constant 16 : index
    %134 = vector.load %arg9[%c2_161, %c16_162] : memref<8x144xf32, #tpu.memory_space<vmem>>, vector<2x16xf32>
    tpu.vector_store %arg9[%c2_161, %c16_162], %133 {strides = array<i32>} : memref<8x144xf32, #tpu.memory_space<vmem>>, vector<2x16xf32>,
    %c18_163 = arith.constant 18 : index
    %c0_164 = arith.constant 0 : index
    %135 = tpu.strided_load %arg8[%c18_163, %c0_164] {strides = array<i32: 2, 1>} : memref<98x16xf32, #tpu.memory_space<vmem>>, vector<2x16xf32>
    %c2_165 = arith.constant 2 : index
    %c32_166 = arith.constant 32 : index
    %136 = vector.load %arg9[%c2_165, %c32_166] : memref<8x144xf32, #tpu.memory_space<vmem>>, vector<2x16xf32>
    tpu.vector_store %arg9[%c2_165, %c32_166], %135 {strides = array<i32>} : memref<8x144xf32, #tpu.memory_space<vmem>>, vector<2x16xf32>,
    %c28_167 = arith.constant 28 : index
    %c0_168 = arith.constant 0 : index
    %137 = tpu.strided_load %arg8[%c28_167, %c0_168] {strides = array<i32: 2, 1>} : memref<98x16xf32, #tpu.memory_space<vmem>>, vector<2x16xf32>
    %c2_169 = arith.constant 2 : index
    %c48_170 = arith.constant 48 : index
    %138 = vector.load %arg9[%c2_169, %c48_170] : memref<8x144xf32, #tpu.memory_space<vmem>>, vector<2x16xf32>
    tpu.vector_store %arg9[%c2_169, %c48_170], %137 {strides = array<i32>} : memref<8x144xf32, #tpu.memory_space<vmem>>, vector<2x16xf32>,
    %c30_171 = arith.constant 30 : index
    %c0_172 = arith.constant 0 : index
    %139 = tpu.strided_load %arg8[%c30_171, %c0_172] {strides = array<i32: 2, 1>} : memref<98x16xf32, #tpu.memory_space<vmem>>, vector<2x16xf32>
    %c2_173 = arith.constant 2 : index
    %c64_174 = arith.constant 64 : index
    %140 = vector.load %arg9[%c2_173, %c64_174] : memref<8x144xf32, #tpu.memory_space<vmem>>, vector<2x16xf32>
    tpu.vector_store %arg9[%c2_173, %c64_174], %139 {strides = array<i32>} : memref<8x144xf32, #tpu.memory_space<vmem>>, vector<2x16xf32>,
    %c32_175 = arith.constant 32 : index
    %c0_176 = arith.constant 0 : index
    %141 = tpu.strided_load %arg8[%c32_175, %c0_176] {strides = array<i32: 2, 1>} : memref<98x16xf32, #tpu.memory_space<vmem>>, vector<2x16xf32>
    %c2_177 = arith.constant 2 : index
    %c80_178 = arith.constant 80 : index
    %142 = vector.load %arg9[%c2_177, %c80_178] : memref<8x144xf32, #tpu.memory_space<vmem>>, vector<2x16xf32>
    tpu.vector_store %arg9[%c2_177, %c80_178], %141 {strides = array<i32>} : memref<8x144xf32, #tpu.memory_space<vmem>>, vector<2x16xf32>,
    %c42 = arith.constant 42 : index
    %c0_179 = arith.constant 0 : index
    %143 = tpu.strided_load %arg8[%c42, %c0_179] {strides = array<i32: 2, 1>} : memref<98x16xf32, #tpu.memory_space<vmem>>, vector<2x16xf32>
    %c2_180 = arith.constant 2 : index
    %c96_181 = arith.constant 96 : index
    %144 = vector.load %arg9[%c2_180, %c96_181] : memref<8x144xf32, #tpu.memory_space<vmem>>, vector<2x16xf32>
    tpu.vector_store %arg9[%c2_180, %c96_181], %143 {strides = array<i32>} : memref<8x144xf32, #tpu.memory_space<vmem>>, vector<2x16xf32>,
    %c44 = arith.constant 44 : index
    %c0_182 = arith.constant 0 : index
    %145 = tpu.strided_load %arg8[%c44, %c0_182] {strides = array<i32: 2, 1>} : memref<98x16xf32, #tpu.memory_space<vmem>>, vector<2x16xf32>
    %c2_183 = arith.constant 2 : index
    %c112_184 = arith.constant 112 : index
    %146 = vector.load %arg9[%c2_183, %c112_184] : memref<8x144xf32, #tpu.memory_space<vmem>>, vector<2x16xf32>
    tpu.vector_store %arg9[%c2_183, %c112_184], %145 {strides = array<i32>} : memref<8x144xf32, #tpu.memory_space<vmem>>, vector<2x16xf32>,
    %c46 = arith.constant 46 : index
    %c0_185 = arith.constant 0 : index
    %147 = tpu.strided_load %arg8[%c46, %c0_185] {strides = array<i32: 2, 1>} : memref<98x16xf32, #tpu.memory_space<vmem>>, vector<2x16xf32>
    %c2_186 = arith.constant 2 : index
    %c128_187 = arith.constant 128 : index
    %148 = vector.load %arg9[%c2_186, %c128_187] : memref<8x144xf32, #tpu.memory_space<vmem>>, vector<2x16xf32>
    tpu.vector_store %arg9[%c2_186, %c128_187], %147 {strides = array<i32>} : memref<8x144xf32, #tpu.memory_space<vmem>>, vector<2x16xf32>,
    %c49 = arith.constant 49 : index
    %c0_188 = arith.constant 0 : index
    %149 = tpu.strided_load %arg8[%c49, %c0_188] {strides = array<i32: 2, 1>} : memref<98x16xf32, #tpu.memory_space<vmem>>, vector<2x16xf32>
    %c4_189 = arith.constant 4 : index
    %c0_190 = arith.constant 0 : index
    %150 = vector.load %arg9[%c4_189, %c0_190] : memref<8x144xf32, #tpu.memory_space<vmem>>, vector<2x16xf32>
    tpu.vector_store %arg9[%c4_189, %c0_190], %149 {strides = array<i32>} : memref<8x144xf32, #tpu.memory_space<vmem>>, vector<2x16xf32>,
    %c51 = arith.constant 51 : index
    %c0_191 = arith.constant 0 : index
    %151 = tpu.strided_load %arg8[%c51, %c0_191] {strides = array<i32: 2, 1>} : memref<98x16xf32, #tpu.memory_space<vmem>>, vector<2x16xf32>
    %c4_192 = arith.constant 4 : index
    %c16_193 = arith.constant 16 : index
    %152 = vector.load %arg9[%c4_192, %c16_193] : memref<8x144xf32, #tpu.memory_space<vmem>>, vector<2x16xf32>
    tpu.vector_store %arg9[%c4_192, %c16_193], %151 {strides = array<i32>} : memref<8x144xf32, #tpu.memory_space<vmem>>, vector<2x16xf32>,
    %c53 = arith.constant 53 : index
    %c0_194 = arith.constant 0 : index
    %153 = tpu.strided_load %arg8[%c53, %c0_194] {strides = array<i32: 2, 1>} : memref<98x16xf32, #tpu.memory_space<vmem>>, vector<2x16xf32>
    %c4_195 = arith.constant 4 : index
    %c32_196 = arith.constant 32 : index
    %154 = vector.load %arg9[%c4_195, %c32_196] : memref<8x144xf32, #tpu.memory_space<vmem>>, vector<2x16xf32>
    tpu.vector_store %arg9[%c4_195, %c32_196], %153 {strides = array<i32>} : memref<8x144xf32, #tpu.memory_space<vmem>>, vector<2x16xf32>,
    %c63 = arith.constant 63 : index
    %c0_197 = arith.constant 0 : index
    %155 = tpu.strided_load %arg8[%c63, %c0_197] {strides = array<i32: 2, 1>} : memref<98x16xf32, #tpu.memory_space<vmem>>, vector<2x16xf32>
    %c4_198 = arith.constant 4 : index
    %c48_199 = arith.constant 48 : index
    %156 = vector.load %arg9[%c4_198, %c48_199] : memref<8x144xf32, #tpu.memory_space<vmem>>, vector<2x16xf32>
    tpu.vector_store %arg9[%c4_198, %c48_199], %155 {strides = array<i32>} : memref<8x144xf32, #tpu.memory_space<vmem>>, vector<2x16xf32>,
    %c65 = arith.constant 65 : index
    %c0_200 = arith.constant 0 : index
    %157 = tpu.strided_load %arg8[%c65, %c0_200] {strides = array<i32: 2, 1>} : memref<98x16xf32, #tpu.memory_space<vmem>>, vector<2x16xf32>
    %c4_201 = arith.constant 4 : index
    %c64_202 = arith.constant 64 : index
    %158 = vector.load %arg9[%c4_201, %c64_202] : memref<8x144xf32, #tpu.memory_space<vmem>>, vector<2x16xf32>
    tpu.vector_store %arg9[%c4_201, %c64_202], %157 {strides = array<i32>} : memref<8x144xf32, #tpu.memory_space<vmem>>, vector<2x16xf32>,
    %c67 = arith.constant 67 : index
    %c0_203 = arith.constant 0 : index
    %159 = tpu.strided_load %arg8[%c67, %c0_203] {strides = array<i32: 2, 1>} : memref<98x16xf32, #tpu.memory_space<vmem>>, vector<2x16xf32>
    %c4_204 = arith.constant 4 : index
    %c80_205 = arith.constant 80 : index
    %160 = vector.load %arg9[%c4_204, %c80_205] : memref<8x144xf32, #tpu.memory_space<vmem>>, vector<2x16xf32>
    tpu.vector_store %arg9[%c4_204, %c80_205], %159 {strides = array<i32>} : memref<8x144xf32, #tpu.memory_space<vmem>>, vector<2x16xf32>,
    %c77 = arith.constant 77 : index
    %c0_206 = arith.constant 0 : index
    %161 = tpu.strided_load %arg8[%c77, %c0_206] {strides = array<i32: 2, 1>} : memref<98x16xf32, #tpu.memory_space<vmem>>, vector<2x16xf32>
    %c4_207 = arith.constant 4 : index
    %c96_208 = arith.constant 96 : index
    %162 = vector.load %arg9[%c4_207, %c96_208] : memref<8x144xf32, #tpu.memory_space<vmem>>, vector<2x16xf32>
    tpu.vector_store %arg9[%c4_207, %c96_208], %161 {strides = array<i32>} : memref<8x144xf32, #tpu.memory_space<vmem>>, vector<2x16xf32>,
    %c79 = arith.constant 79 : index
    %c0_209 = arith.constant 0 : index
    %163 = tpu.strided_load %arg8[%c79, %c0_209] {strides = array<i32: 2, 1>} : memref<98x16xf32, #tpu.memory_space<vmem>>, vector<2x16xf32>
    %c4_210 = arith.constant 4 : index
    %c112_211 = arith.constant 112 : index
    %164 = vector.load %arg9[%c4_210, %c112_211] : memref<8x144xf32, #tpu.memory_space<vmem>>, vector<2x16xf32>
    tpu.vector_store %arg9[%c4_210, %c112_211], %163 {strides = array<i32>} : memref<8x144xf32, #tpu.memory_space<vmem>>, vector<2x16xf32>,
    %c81 = arith.constant 81 : index
    %c0_212 = arith.constant 0 : index
    %165 = tpu.strided_load %arg8[%c81, %c0_212] {strides = array<i32: 2, 1>} : memref<98x16xf32, #tpu.memory_space<vmem>>, vector<2x16xf32>
    %c4_213 = arith.constant 4 : index
    %c128_214 = arith.constant 128 : index
    %166 = vector.load %arg9[%c4_213, %c128_214] : memref<8x144xf32, #tpu.memory_space<vmem>>, vector<2x16xf32>
    tpu.vector_store %arg9[%c4_213, %c128_214], %165 {strides = array<i32>} : memref<8x144xf32, #tpu.memory_space<vmem>>, vector<2x16xf32>,
    %c63_215 = arith.constant 63 : index
    %c0_216 = arith.constant 0 : index
    %167 = tpu.strided_load %arg8[%c63_215, %c0_216] {strides = array<i32: 2, 1>} : memref<98x16xf32, #tpu.memory_space<vmem>>, vector<2x16xf32>
    %c6 = arith.constant 6 : index
    %c0_217 = arith.constant 0 : index
    %168 = vector.load %arg9[%c6, %c0_217] : memref<8x144xf32, #tpu.memory_space<vmem>>, vector<2x16xf32>
    tpu.vector_store %arg9[%c6, %c0_217], %167 {strides = array<i32>} : memref<8x144xf32, #tpu.memory_space<vmem>>, vector<2x16xf32>,
    %c65_218 = arith.constant 65 : index
    %c0_219 = arith.constant 0 : index
    %169 = tpu.strided_load %arg8[%c65_218, %c0_219] {strides = array<i32: 2, 1>} : memref<98x16xf32, #tpu.memory_space<vmem>>, vector<2x16xf32>
    %c6_220 = arith.constant 6 : index
    %c16_221 = arith.constant 16 : index
    %170 = vector.load %arg9[%c6_220, %c16_221] : memref<8x144xf32, #tpu.memory_space<vmem>>, vector<2x16xf32>
    tpu.vector_store %arg9[%c6_220, %c16_221], %169 {strides = array<i32>} : memref<8x144xf32, #tpu.memory_space<vmem>>, vector<2x16xf32>,
    %c67_222 = arith.constant 67 : index
    %c0_223 = arith.constant 0 : index
    %171 = tpu.strided_load %arg8[%c67_222, %c0_223] {strides = array<i32: 2, 1>} : memref<98x16xf32, #tpu.memory_space<vmem>>, vector<2x16xf32>
    %c6_224 = arith.constant 6 : index
    %c32_225 = arith.constant 32 : index
    %172 = vector.load %arg9[%c6_224, %c32_225] : memref<8x144xf32, #tpu.memory_space<vmem>>, vector<2x16xf32>
    tpu.vector_store %arg9[%c6_224, %c32_225], %171 {strides = array<i32>} : memref<8x144xf32, #tpu.memory_space<vmem>>, vector<2x16xf32>,
    %c77_226 = arith.constant 77 : index
    %c0_227 = arith.constant 0 : index
    %173 = tpu.strided_load %arg8[%c77_226, %c0_227] {strides = array<i32: 2, 1>} : memref<98x16xf32, #tpu.memory_space<vmem>>, vector<2x16xf32>
    %c6_228 = arith.constant 6 : index
    %c48_229 = arith.constant 48 : index
    %174 = vector.load %arg9[%c6_228, %c48_229] : memref<8x144xf32, #tpu.memory_space<vmem>>, vector<2x16xf32>
    tpu.vector_store %arg9[%c6_228, %c48_229], %173 {strides = array<i32>} : memref<8x144xf32, #tpu.memory_space<vmem>>, vector<2x16xf32>,
    %c79_230 = arith.constant 79 : index
    %c0_231 = arith.constant 0 : index
    %175 = tpu.strided_load %arg8[%c79_230, %c0_231] {strides = array<i32: 2, 1>} : memref<98x16xf32, #tpu.memory_space<vmem>>, vector<2x16xf32>
    %c6_232 = arith.constant 6 : index
    %c64_233 = arith.constant 64 : index
    %176 = vector.load %arg9[%c6_232, %c64_233] : memref<8x144xf32, #tpu.memory_space<vmem>>, vector<2x16xf32>
    tpu.vector_store %arg9[%c6_232, %c64_233], %175 {strides = array<i32>} : memref<8x144xf32, #tpu.memory_space<vmem>>, vector<2x16xf32>,
    %c81_234 = arith.constant 81 : index
    %c0_235 = arith.constant 0 : index
    %177 = tpu.strided_load %arg8[%c81_234, %c0_235] {strides = array<i32: 2, 1>} : memref<98x16xf32, #tpu.memory_space<vmem>>, vector<2x16xf32>
    %c6_236 = arith.constant 6 : index
    %c80_237 = arith.constant 80 : index
    %178 = vector.load %arg9[%c6_236, %c80_237] : memref<8x144xf32, #tpu.memory_space<vmem>>, vector<2x16xf32>
    tpu.vector_store %arg9[%c6_236, %c80_237], %177 {strides = array<i32>} : memref<8x144xf32, #tpu.memory_space<vmem>>, vector<2x16xf32>,
    %c91_238 = arith.constant 91 : index
    %c0_239 = arith.constant 0 : index
    %179 = tpu.strided_load %arg8[%c91_238, %c0_239] {strides = array<i32: 2, 1>} : memref<98x16xf32, #tpu.memory_space<vmem>>, vector<2x16xf32>
    %c6_240 = arith.constant 6 : index
    %c96_241 = arith.constant 96 : index
    %180 = vector.load %arg9[%c6_240, %c96_241] : memref<8x144xf32, #tpu.memory_space<vmem>>, vector<2x16xf32>
    tpu.vector_store %arg9[%c6_240, %c96_241], %179 {strides = array<i32>} : memref<8x144xf32, #tpu.memory_space<vmem>>, vector<2x16xf32>,
    %c93 = arith.constant 93 : index
    %c0_242 = arith.constant 0 : index
    %181 = tpu.strided_load %arg8[%c93, %c0_242] {strides = array<i32: 2, 1>} : memref<98x16xf32, #tpu.memory_space<vmem>>, vector<2x16xf32>
    %c6_243 = arith.constant 6 : index
    %c112_244 = arith.constant 112 : index
    %182 = vector.load %arg9[%c6_243, %c112_244] : memref<8x144xf32, #tpu.memory_space<vmem>>, vector<2x16xf32>
    tpu.vector_store %arg9[%c6_243, %c112_244], %181 {strides = array<i32>} : memref<8x144xf32, #tpu.memory_space<vmem>>, vector<2x16xf32>,
    %c95 = arith.constant 95 : index
    %c0_245 = arith.constant 0 : index
    %183 = tpu.strided_load %arg8[%c95, %c0_245] {strides = array<i32: 2, 1>} : memref<98x16xf32, #tpu.memory_space<vmem>>, vector<2x16xf32>
    %c6_246 = arith.constant 6 : index
    %c128_247 = arith.constant 128 : index
    %184 = vector.load %arg9[%c6_246, %c128_247] : memref<8x144xf32, #tpu.memory_space<vmem>>, vector<2x16xf32>
    tpu.vector_store %arg9[%c6_246, %c128_247], %183 {strides = array<i32>} : memref<8x144xf32, #tpu.memory_space<vmem>>, vector<2x16xf32>,
    %c0_248 = arith.constant 0 : index
    %c0_249 = arith.constant 0 : index
    %185 = vector.load %arg9[%c0_248, %c0_249] : memref<8x144xf32, #tpu.memory_space<vmem>>, vector<8x144xf32>
    %c0_250 = arith.constant 0 : index
    %c0_251 = arith.constant 0 : index
    %186 = vector.load %arg4[%c0_250, %c0_251] : memref<144x128xf32, #tpu.memory_space<vmem>>, vector<144x128xf32>
    %cst_252 = arith.constant dense<0.000000e+00> : vector<8x128xf32>
    %187 = tpu.matmul %185, %186, %cst_252 {dimension_numbers = #tpu.dot_dimension_numbers<[1], [0], [0], [1], [0, 0, 1, 1], [], []>} : vector<8x144xf32>, vector<144x128xf32>, vector<8x128xf32> -> vector<8x128xf32>
    %188 = vector.broadcast %2 : vector<1x128xf32> to vector<8x128xf32>
    %189 = arith.addf %187, %188 : vector<8x128xf32>
    %190 = vector.extract_strided_slice %189 {offsets = [0, 0], sizes = [8, 32], strides = [1, 1]} : vector<8x128xf32> to vector<8x32xf32>
    %cst_253 = arith.constant dense<0.000000e+00> : vector<8xf32>
    %191 = vector.multi_reduction <add>, %190, %cst_253 [1] : vector<8x32xf32> to vector<8xf32>
    %192 = vector.shape_cast %191 : vector<8xf32> to vector<8x1xf32>
    %cst_254 = arith.constant 3.200000e+01 : f32
    %193 = vector.broadcast %cst_254 : f32 to vector<8x1xf32>
    %194 = arith.divf %192, %193 : vector<8x1xf32>
    %195 = vector.broadcast %194 : vector<8x1xf32> to vector<8x32xf32>
    %196 = arith.subf %190, %195 : vector<8x32xf32>
    %197 = arith.mulf %196, %196 : vector<8x32xf32>
    %cst_255 = arith.constant dense<0.000000e+00> : vector<8xf32>
    %198 = vector.multi_reduction <add>, %197, %cst_255 [1] : vector<8x32xf32> to vector<8xf32>
    %199 = vector.shape_cast %198 : vector<8xf32> to vector<8x1xf32>
    %cst_256 = arith.constant 3.200000e+01 : f32
    %200 = vector.broadcast %cst_256 : f32 to vector<8x1xf32>
    %201 = arith.divf %199, %200 : vector<8x1xf32>
    %202 = vector.broadcast %194 : vector<8x1xf32> to vector<8x32xf32>
    %203 = arith.subf %190, %202 : vector<8x32xf32>
    %cst_257 = arith.constant 9.99999974E-6 : f32
    %204 = vector.broadcast %cst_257 : f32 to vector<8x1xf32>
    %205 = arith.addf %201, %204 : vector<8x1xf32>
    %206 = math.rsqrt %205 : vector<8x1xf32>
    %207 = vector.broadcast %206 : vector<8x1xf32> to vector<8x32xf32>
    %208 = arith.mulf %203, %207 : vector<8x32xf32>
    %209 = vector.broadcast %3 : vector<1x32xf32> to vector<8x32xf32>
    %210 = arith.mulf %208, %209 : vector<8x32xf32>
    %211 = vector.broadcast %4 : vector<1x32xf32> to vector<8x32xf32>
    %212 = arith.addf %210, %211 : vector<8x32xf32>
    %c0_258 = arith.constant 0 : index
    %c0_259 = arith.constant 0 : index
    %213 = vector.load %arg5[%c0_258, %c0_259] : memref<32x128xf32, #tpu.memory_space<vmem>>, vector<32x128xf32>
    %cst_260 = arith.constant dense<0.000000e+00> : vector<8x128xf32>
    %214 = tpu.matmul %212, %213, %cst_260 {dimension_numbers = #tpu.dot_dimension_numbers<[1], [0], [0], [1], [0, 0, 1, 1], [], []>} : vector<8x32xf32>, vector<32x128xf32>, vector<8x128xf32> -> vector<8x128xf32>
    %215 = vector.broadcast %5 : vector<1x128xf32> to vector<8x128xf32>
    %216 = arith.addf %214, %215 : vector<8x128xf32>
    %217 = vector.extract_strided_slice %216 {offsets = [0, 0], sizes = [8, 64], strides = [1, 1]} : vector<8x128xf32> to vector<8x64xf32>
    %cst_261 = arith.constant dense<0.000000e+00> : vector<8xf32>
    %218 = vector.multi_reduction <add>, %217, %cst_261 [1] : vector<8x64xf32> to vector<8xf32>
    %219 = vector.shape_cast %218 : vector<8xf32> to vector<8x1xf32>
    %cst_262 = arith.constant 6.400000e+01 : f32
    %220 = vector.broadcast %cst_262 : f32 to vector<8x1xf32>
    %221 = arith.divf %219, %220 : vector<8x1xf32>
    %222 = vector.broadcast %221 : vector<8x1xf32> to vector<8x64xf32>
    %223 = arith.subf %217, %222 : vector<8x64xf32>
    %224 = arith.mulf %223, %223 : vector<8x64xf32>
    %cst_263 = arith.constant dense<0.000000e+00> : vector<8xf32>
    %225 = vector.multi_reduction <add>, %224, %cst_263 [1] : vector<8x64xf32> to vector<8xf32>
    %226 = vector.shape_cast %225 : vector<8xf32> to vector<8x1xf32>
    %cst_264 = arith.constant 6.400000e+01 : f32
    %227 = vector.broadcast %cst_264 : f32 to vector<8x1xf32>
    %228 = arith.divf %226, %227 : vector<8x1xf32>
    %229 = vector.broadcast %221 : vector<8x1xf32> to vector<8x64xf32>
    %230 = arith.subf %217, %229 : vector<8x64xf32>
    %cst_265 = arith.constant 9.99999974E-6 : f32
    %231 = vector.broadcast %cst_265 : f32 to vector<8x1xf32>
    %232 = arith.addf %228, %231 : vector<8x1xf32>
    %233 = math.rsqrt %232 : vector<8x1xf32>
    %234 = vector.broadcast %233 : vector<8x1xf32> to vector<8x64xf32>
    %235 = arith.mulf %230, %234 : vector<8x64xf32>
    %cst_266 = arith.constant 5.000000e-01 : f32
    %236 = vector.broadcast %cst_266 : f32 to vector<8x64xf32>
    %237 = arith.mulf %235, %236 : vector<8x64xf32>
    %238 = arith.mulf %235, %235 : vector<8x64xf32>
    %239 = arith.mulf %238, %235 : vector<8x64xf32>
    %cst_267 = arith.constant 4.471500e-02 : f32
    %240 = vector.broadcast %cst_267 : f32 to vector<8x64xf32>
    %241 = arith.mulf %239, %240 : vector<8x64xf32>
    %242 = arith.addf %235, %241 : vector<8x64xf32>
    %cst_268 = arith.constant 0.797884583 : f32
    %243 = vector.broadcast %cst_268 : f32 to vector<8x64xf32>
    %244 = arith.mulf %242, %243 : vector<8x64xf32>
    %245 = math.tanh %244 : vector<8x64xf32>
    %246 = arith.mulf %237, %245 : vector<8x64xf32>
    %cst_269 = arith.constant 0.000000e+00 : f32
    %247 = vector.broadcast %cst_269 : f32 to vector<8x64xf32>
    %248 = tpu.concatenate %246, %247 in 1 : vector<8x64xf32>, vector<8x64xf32> -> vector<8x128xf32>
    %c0_270 = arith.constant 0 : index
    %c0_271 = arith.constant 0 : index
    %249 = vector.load %arg6[%c0_270, %c0_271] : memref<8x128xf32, #tpu.memory_space<vmem>>, vector<8x128xf32>
    tpu.vector_store %arg6[%c0_270, %c0_271], %248 {strides = array<i32>} : memref<8x128xf32, #tpu.memory_space<vmem>>, vector<8x128xf32>,
    return
  }
  func.func @transform_0(%arg0: i32) -> (i32, i32) {
    %c0_i32 = arith.constant 0 : i32
    %c0_i32_0 = arith.constant 0 : i32
    %c0_i32_1 = arith.constant 0 : i32
    return %c0_i32, %c0_i32_0 : i32, i32
  }
  func.func @transform_1(%arg0: i32) -> (i32, i32) {
    %c0_i32 = arith.constant 0 : i32
    %c0_i32_0 = arith.constant 0 : i32
    %c0_i32_1 = arith.constant 0 : i32
    return %c0_i32, %c0_i32_0 : i32, i32
  }
  func.func @transform_2(%arg0: i32) -> (i32, i32) {
    %c0_i32 = arith.constant 0 : i32
    %c0_i32_0 = arith.constant 0 : i32
    %c0_i32_1 = arith.constant 0 : i32
    return %c0_i32, %c0_i32_0 : i32, i32
  }
  func.func @transform_3(%arg0: i32) -> (i32, i32) {
    %c0_i32 = arith.constant 0 : i32
    %c0_i32_0 = arith.constant 0 : i32
    %c0_i32_1 = arith.constant 0 : i32
    return %c0_i32, %c0_i32_0 : i32, i32
  }
  func.func @transform_4(%arg0: i32) -> (i32, i32) {
    %c0_i32 = arith.constant 0 : i32
    %c0_i32_0 = arith.constant 0 : i32
    %c0_i32_1 = arith.constant 0 : i32
    return %c0_i32, %c0_i32_0 : i32, i32
  }
  func.func @transform_5(%arg0: i32) -> (i32, i32) {
    %c0_i32 = arith.constant 0 : i32
    %c0_i32_0 = arith.constant 0 : i32
    %c0_i32_1 = arith.constant 0 : i32
    return %c0_i32, %c0_i32_0 : i32, i32
  }
}

</mosaic_0001>

<bundles_post_ra>
// kernel: model_forward.1
= control target key start
LH: loop header
LB: loop body
LE: loop exit
PB: predicated region body
PF: predicated region fallthrough
CT: control target
= control target key end

     0   :  { %s936_s20 = smov 8   ;;  %s937_s23 = smov 16   ;;  %s1346_s0 = inlined_call_operand.vmem [shape: f32[648,8], index: 0, kind: input, shape index: {}]   ;;  %s1347_s1 = inlined_call_operand.vmem [shape: f32[8,128], index: 1, kind: input, shape index: {}]   ;;  %s1348_s2 = inlined_call_operand.vmem [shape: f32[32,128], index: 2, kind: input, shape index: {}]   ;;  %s1349_s3 = inlined_call_operand.vmem [shape: f32[144,128], index: 3, kind: input, shape index: {}]   ;;  %s1350_s4 = inlined_call_operand.vmem [shape: f32[32,128], index: 4, kind: input, shape index: {}]   ;;  %s1351_s5 = inlined_call_operand.hbm [shape: f32[8,128], index: 5, kind: output, shape index: {}]  }
   0x1   :  { %v835_v0 = vld [vmem:[%s1346_s0 + $0x1] ss:$4 sm:$0x1f]  ;;  %v836_v1 = vld [vmem:[%s1346_s0 + $0x12] ss:$4 sm:$0x1f] }
   0x2   :  { %28 = vrot.lane.b32.xlu0 %v835_v0, %s936_s20  ;;  %36 = vrot.lane.b32.xlu1 %v836_v1, %s937_s23  ;;  %v837_v2 = vld [vmem:[%s1346_s0 + $0x13] ss:$4 sm:$0x1f] }
   0x3   :  { %10 = vsyncpa [#allocation6], 0  ;;  %s938_s26 = smov 24   ;;  %v839_v3 = vld [vmem:[%s1346_s0 + $0x49] ss:$4 sm:$0x1f] }
   0x4   :  { %44 = vrot.lane.b32.xlu2 %v837_v2, %s938_s26  ;;  %v840_v4 = vld [vmem:[%s1346_s0 + $0x5a] ss:$4 sm:$0x1f]  ;;  %v841_v5 = vld [vmem:[%s1346_s0 + $0x5b] ss:$4 sm:$0x1f] }
   0x5   :  { %v843_v6 = vld [vmem:[%s1346_s0 + $0x91] ss:$4 sm:$0x1f]  ;;  %v844_v8 = vld [vmem:[%s1346_s0 + $0xa2] ss:$4 sm:$0x1f] }
   0x6   :  { %v847_v7 = vld [vmem:[%s1346_s0 + $0xd9] ss:$4 sm:$0x1f]  ;;  %v848_v9 = vld [vmem:[%s1346_s0 + $0xea] ss:$4 sm:$0x1f] }
   0x7   :  { %v845_v10 = vld [vmem:[%s1346_s0 + $0xa3] ss:$4 sm:$0x1f]  ;;  %v859_v12 = vld [vmem:[%s1346_s0 + $0x18d] ss:$4 sm:$0x1f] }
   0x8   :  { %v849_v11 = vld [vmem:[%s1346_s0 + $0xeb] ss:$4 sm:$0x1f]  ;;  %v863_v13 = vld [vmem:[%s1346_s0 + $0x1d5] ss:$4 sm:$0x1f] }
   0x9   :  { %v860_v14 = vld [vmem:[%s1346_s0 + $0x19e] ss:$4 sm:$0x1f]  ;;  %v861_v16 = vld [vmem:[%s1346_s0 + $0x19f] ss:$4 sm:$0x1f] }
   0xa   :  { %55 = vrot.lane.b32.xlu0 %v839_v3, %s936_s20  ;;  %62 = vrot.lane.b32.xlu1 %v840_v4, %s937_s23  ;;  %v864_v15 = vld [vmem:[%s1346_s0 + $0x1e6] ss:$4 sm:$0x1f]  ;;  %v865_v17 = vld [vmem:[%s1346_s0 + $0x1e7] ss:$4 sm:$0x1f] }
   0xb   :  { %v851_v18 = vld [vmem:[%s1346_s0 + $0x121] ss:$4 sm:$0x1f]  ;;  %v852_v19 = vld [vmem:[%s1346_s0 + $0x132] ss:$4 sm:$0x1f] }
   0xc   :  { %69 = vrot.lane.b32.xlu2 %v841_v5, %s938_s26  ;;  %v853_v20 = vld [vmem:[%s1346_s0 + $0x133] ss:$4 sm:$0x1f]  ;;  %v867_v21 = vld [vmem:[%s1346_s0 + $0x21d] ss:$4 sm:$0x1f] }
   0xd   :  { %v871_v22 = vld [vmem:[%s1346_s0 + $0x265] ss:$4 sm:$0x1f]  ;;  %v868_v23 = vld [vmem:[%s1346_s0 + $0x22e] ss:$4 sm:$0x1f] }
   0xe   :  { %v872_v24 = vld [vmem:[%s1346_s0 + $0x276] ss:$4 sm:$0x1f]  ;;  %v869_v25 = vld [vmem:[%s1346_s0 + $0x22f] ss:$4 sm:$0x1f] }
   0xf   :  { %v873_v26 = vld [vmem:[%s1346_s0 + $0x277] ss:$4 sm:$0x1f]  ;;  %v855_v27 = vld [vmem:[%s1346_s0 + $0x145] ss:$4 sm:$0x1f] }
  0x10   :  { %v856_v28 = vld [vmem:[%s1346_s0 + $0x156] ss:$4 sm:$0x1f]  ;;  %v857_v29 = vld [vmem:[%s1346_s0 + $0x157] ss:$4 sm:$0x1f] }
  0x11   :  { %v22_v30 = vld [vmem:[%s1346_s0] ss:$4 sm:$0x1f]  ;;  %vm23_vm0 = vcmask 61440   ;;  %v275_v32 = vld [vmem:[%s1348_s2 + $0x18] sm:$0xff]  ;;  %vm31_vm1 = vcmask 127040  }
  0x12   :  { %79 = vrot.lane.b32.xlu0 %v843_v6, %s936_s20  ;;  %103 = vrot.lane.b32.xlu1 %v847_v7, %s936_s20  ;;  %24 = vst.msk [vmem:[#allocation2] sm:$0x1f] %vm23_vm0, %v22_v30  ;;  %v838_v31 = vld [vmem:[%s1346_s0 + $0x48] ss:$4 sm:$0x1f]  ;;  %v272_v38 = vld [vmem:[%s1348_s2] sm:$0xff] }
  0x13   :  { %51 = vst.msk [vmem:[#allocation2 + $0x5] sm:$0x1f] %vm23_vm0, %v838_v31  ;;  %v274_v33 = vld [vmem:[%s1348_s2 + $0x10] sm:$0xff]  ;;  %311 = vmatpush.msra.mxu0 %v275_v32  ;;  %883 = vmatpush.msra.mxu2 %v275_v32  ;;  %v273_v35 = vld [vmem:[%s1348_s2 + $0x8] sm:$0xff]  ;;  %vm39_vm2 = vcmask 192640   ;;  %vm47_vm3 = vcmask 258240  }
  0x14   :  { %86 = vrot.lane.b32.xlu2 %v844_v8, %s937_s23  ;;  %v842_v34 = vld [vmem:[%s1346_s0 + $0x90] ss:$4 sm:$0x1f]  ;;  %vm277_vm4 = vcmask 261120   ;;  %vm337_vm5 = vcmask 130048   ;;  %v939_v5 = vmov 0.0  }
  0x15   :  { %75 = vst.msk [vmem:[#allocation2 + $0xa] sm:$0x1f] %vm23_vm0, %v842_v34  ;;  %312 = vmatpush.msra.mxu0 %v274_v33  ;;  %884 = vmatpush.msra.mxu2 %v274_v33  ;;  %v846_v37 = vld [vmem:[%s1346_s0 + $0xd8] ss:$4 sm:$0x1f]  ;;  %s941_s15 = smov 96  }
  0x16   :  { %99 = vst.msk [vmem:[#allocation2 + $0xf] sm:$0x1f] %vm23_vm0, %v846_v37  ;;  %v858_v40 = vld [vmem:[%s1346_s0 + $0x18c] ss:$4 sm:$0x1f]  ;;  %vm350_vm6 = vcmask 123904  }
  0x17   :  { %313 = vmatpush.msra.mxu0 %v273_v35  ;;  %885 = vmatpush.msra.mxu2 %v273_v35  ;;  %171 = vst.msk [vmem:[#allocation2 + $0x1e] sm:$0x1f] %vm23_vm0, %v858_v40  ;;  %v862_v43 = vld [vmem:[%s1346_s0 + $0x1d4] ss:$4 sm:$0x1f]  ;;  %vm352_vm7 = vcmask 126976  }
  0x18   :  { %195 = vst.msk [vmem:[#allocation2 + $0x23] sm:$0x1f] %vm23_vm0, %v862_v43  ;;  %v850_v47 = vld [vmem:[%s1346_s0 + $0x120] ss:$4 sm:$0x1f]  ;;  %vm354_vm8 = vcmask 130053  }
  0x19   :  { %314 = vmatpush.msra.mxu0 %v272_v38  ;;  %886 = vmatpush.msra.mxu2 %v272_v38  ;;  %123 = vst.msk [vmem:[#allocation2 + $0x14] sm:$0x1f] %vm23_vm0, %v850_v47  ;;  %v866_v52 = vld [vmem:[%s1346_s0 + $0x21c] ss:$4 sm:$0x1f]  ;;  %s942_s17 = smov 48  }
  0x1a   :  { %110 = vrot.lane.b32.xlu0 %v848_v9, %s937_s23  ;;  %93 = vrot.lane.b32.xlu1 %v845_v10, %s938_s26  ;;  %219 = vst.msk [vmem:[#allocation2 + $0x28] sm:$0x1f] %vm23_vm0, %v866_v52  ;;  %v870_v56 = vld [vmem:[%s1346_s0 + $0x264] ss:$4 sm:$0x1f]  ;;  %vm443_vm9 = vcmask 125954  }
  0x1b   :  { %243 = vst.msk [vmem:[#allocation2 + $0x2d] sm:$0x1f] %vm23_vm0, %v870_v56  ;;  %v854_v61 = vld [vmem:[%s1346_s0 + $0x144] ss:$4 sm:$0x1f]  ;;  %s940_s0 = smov 32  }
  0x1c   :  { %117 = vrot.lane.b32.xlu2 %v849_v11, %s938_s26  ;;  %147 = vst.msk [vmem:[#allocation2 + $0x19] sm:$0x1f] %vm23_vm0, %v854_v61  ;;  %vm371_vm10 = vcmask 124928   ;;  %vm369_vm11 = vcmask 130054   ;;  %vm361_vm12 = vcmask 125952   ;;  %s944_s22 = smov 80  }
  0x1d   :  { %338 = vst.msk [vmem:[#allocation3] sm:$0xff] %vm337_vm5, %v939_v5  ;;  %vm523_vm13 = vcmask 259204   ;;  %vm514_vm14 = vcmask 128004   ;;  %vm386_vm15 = vcmask 255104   ;;  %vm394_vm0 = vcmask 386304   ;;  %s945_s24 = smov 112  }
  0x1e   :  { %339 = vst.msk [vmem:[#allocation3 + $0x8] sm:$0xff] %vm337_vm5, %v939_v5  ;;  %s826_s13 = sshll.u32 %s1351_s5, 4  ;;  %s827_s13 = int_to_ptr.hbm [resolvable:$true] %s826_s13 }
  0x1f   :  { %340 = vst.msk [vmem:[#allocation3 + $0x10] sm:$0xff] %vm337_vm5, %v939_v5 }
  0x20   :  { %341 = vst.msk [vmem:[#allocation3 + $0x18] sm:$0xff] %vm337_vm5, %v939_v5 }
  0x21   :  { %342 = vst.msk [vmem:[#allocation3 + $0x20] sm:$0xff] %vm337_vm5, %v939_v5 }
  0x22   :  { %175 = vrot.lane.b32.xlu0 %v859_v12, %s936_s20  ;;  %199 = vrot.lane.b32.xlu1 %v863_v13, %s936_s20  ;;  %343 = vst.msk [vmem:[#allocation3 + $0x28] sm:$0xff] %vm337_vm5, %v939_v5 }
  0x23   :  { %344 = vst.msk [vmem:[#allocation3 + $0x30] sm:$0xff] %vm337_vm5, %v939_v5 }
  0x24   :  { %182 = vrot.lane.b32.xlu2 %v860_v14, %s937_s23  ;;  %v381_v9 = vld [vmem:[#allocation3 + $0x2] ss:$2 sm:$0x3]  ;;  %345 = vst.msk [vmem:[#allocation3 + $0x38] sm:$0xff] %vm337_vm5, %v939_v5 }
  0x25   :  { %v389_v10 = vld [vmem:[#allocation3 + $0x4] ss:$2 sm:$0x3]  ;;  %346 = vst.msk [vmem:[#allocation3 + $0x40] sm:$0xff] %vm337_vm5, %v939_v5 }
  0x26   :  { %347 = vst.msk [vmem:[#allocation3 + $0x48] sm:$0xff] %vm337_vm5, %v939_v5 }
  0x27   :  { %348 = vst.msk [vmem:[#allocation3 + $0x50] sm:$0xff] %vm337_vm5, %v939_v5 }
  0x28   :  { %349 = vst.msk [vmem:[#allocation3 + $0x58] sm:$0xff] %vm337_vm5, %v939_v5 }
  0x29   :  { %351 = vst.msk [vmem:[#allocation3 + $0x60] sm:$0x3] %vm350_vm6, %v939_v5 }
  0x2a   :  { %206 = vrot.lane.b32.xlu0 %v864_v15, %s937_s23  ;;  %189 = vrot.lane.b32.xlu1 %v861_v16, %s938_s26  ;;  %v517_v14 = vld [vmem:[#allocation3 + $0x33] ss:$2 sm:$0x3] }
  0x2b   :  { %v519_v15 = vrot.slane %v517_v14, 4 }
  0x2c   :  { %213 = vrot.lane.b32.xlu2 %v865_v17, %s938_s26 }
  0x30   :  { %v649_v40 = vld [vmem:[#allocation3 + $0x5f] ss:$2 sm:$0x3] }
  0x32   :  { %127 = vrot.lane.b32.xlu0 %v851_v18, %s936_s20  ;;  %134 = vrot.lane.b32.xlu1 %v852_v19, %s937_s23 }
  0x34   :  { %141 = vrot.lane.b32.xlu2 %v853_v20, %s938_s26 }
  0x3a   :  { %223 = vrot.lane.b32.xlu0 %v867_v21, %s936_s20  ;;  %247 = vrot.lane.b32.xlu1 %v871_v22, %s936_s20  ;;  %v631_v22 = vld [vmem:[#allocation3 + $0x5b] ss:$2 sm:$0x3] }
  0x3c   :  { %230 = vrot.lane.b32.xlu2 %v868_v23, %s937_s23  ;;  %v633_v23 = vrot.slane %v631_v22, 2 }
  0x42   :  { %254 = vrot.lane.b32.xlu0 %v872_v24, %s937_s23  ;;  %237 = vrot.lane.b32.xlu1 %v869_v25, %s938_s26  ;;  %v526_v24 = vld [vmem:[#allocation3 + $0x35] ss:$2 sm:$0x3] }
  0x43   :  { %v528_v25 = vrot.slane %v526_v24, 4 }
  0x44   :  { %261 = vrot.lane.b32.xlu2 %v873_v26, %s938_s26  ;;  %v486_v26 = vld [vmem:[#allocation3 + $0x2a] ss:$2 sm:$0x3] }
  0x4a   :  { %151 = vrot.lane.b32.xlu0 %v855_v27, %s936_s20  ;;  %158 = vrot.lane.b32.xlu1 %v856_v28, %s937_s23  ;;  %v488_v27 = vrot.slane %v486_v26, 6  ;;  %v1210_v28 = vld [vmem:[%s1347_s1] sm:$0xff]  ;;  %s943_s1 = smov 64  }
  0x4c   :  { %165 = vrot.lane.b32.xlu2 %v857_v29, %s938_s26  ;;  %v1213_v29 = vperm.slane %v1210_v28, 0 }
  0x52   :  { %383 = vrot.lane.b32.xlu0 %v381_v9, %s937_s23  ;;  %391 = vrot.lane.b32.xlu1 %v389_v10, %s940_s0 }
  0x54   :  { %520 = vrot.lane.b32.xlu2 %v519_v15, %s937_s23 }
  0x5a   :  { %529 = vrot.lane.b32.xlu0 %v528_v25, %s940_s0 }
  0x5c   :  { %634 = vrot.lane.b32.xlu2 %v633_v23, %s941_s15 }
  0x5e   :  { %v45_v36 = vpop.permute.xlu2 %44 }
  0x62   :  { %489 = vrot.lane.b32.xlu0 %v488_v27, %s941_s15 }
  0x66   :  { %v70_v39 = vpop.permute.xlu2 %69 }
  0x6e   :  { %v87_v44 = vpop.permute.xlu2 %86 }
  0x74   :  { %v29_v41 = vpop.permute.xlu0 %28  ;;  %v37_v42 = vpop.permute.xlu1 %36 }
  0x75   :  { %32 = vst.msk [vmem:[#allocation2] sm:$0x1f] %vm31_vm1, %v29_v41 }
  0x76   :  { %40 = vst.msk [vmem:[#allocation2] sm:$0x1f] %vm39_vm2, %v37_v42  ;;  %v118_v48 = vpop.permute.xlu2 %117  ;;  %v651_v42 = vrot.slane %v649_v40, 2 }
  0x77   :  { %48 = vst.msk [vmem:[#allocation2] sm:$0x1f] %vm47_vm3, %v45_v36 }
  0x78   :  { %653 = vst.msk [vmem:[#allocation4 + $0x8] sm:$0xc0] %vm369_vm11, %v651_v42 }
  0x7c   :  { %v56_v45 = vpop.permute.xlu0 %55  ;;  %v63_v46 = vpop.permute.xlu1 %62 }
  0x7d   :  { %58 = vst.msk [vmem:[#allocation2 + $0x5] sm:$0x1f] %vm31_vm1, %v56_v45 }
  0x7e   :  { %65 = vst.msk [vmem:[#allocation2 + $0x5] sm:$0x1f] %vm39_vm2, %v63_v46  ;;  %v183_v53 = vpop.permute.xlu2 %182  ;;  %v504_v46 = vld [vmem:[#allocation3 + $0x2e] ss:$2 sm:$0x3] }
  0x7f   :  { %72 = vst.msk [vmem:[#allocation2 + $0x5] sm:$0x1f] %vm47_vm3, %v70_v39  ;;  %v506_v47 = vrot.slane %v504_v46, 6 }
  0x81   :  { %508 = vst.msk [vmem:[#allocation4 + $0x8] sm:$0xc] %vm443_vm9, %v506_v47  ;;  %v671_v47 = vld [vmem:[%s1349_s3 + $0x78] sm:$0xff] }
  0x82   :  { %678 = vmatpush.msra.mxu1 %v671_v47 }
  0x84   :  { %v80_v49 = vpop.permute.xlu0 %79  ;;  %v104_v50 = vpop.permute.xlu1 %103 }
  0x85   :  { %82 = vst.msk [vmem:[#allocation2 + $0xa] sm:$0x1f] %vm31_vm1, %v80_v49  ;;  %v672_v49 = vld [vmem:[%s1349_s3 + $0x80] sm:$0xff] }
  0x86   :  { %89 = vst.msk [vmem:[#allocation2 + $0xa] sm:$0x1f] %vm39_vm2, %v87_v44  ;;  %v265_v51 = vld [vmem:[#allocation2] sm:$0xff]  ;;  %v214_v58 = vpop.permute.xlu2 %213 }
  0x87   :  { %106 = vst.msk [vmem:[#allocation2 + $0xf] sm:$0x1f] %vm31_vm1, %v104_v50  ;;  %874 = vmatmul.msk.f32.vlgmr.msra.gmra.mxu0 %vm277_vm4, %v265_v51 }
  0x8c   :  { %v111_v54 = vpop.permute.xlu0 %110  ;;  %v94_v55 = vpop.permute.xlu1 %93 }
  0x8d   :  { %113 = vst.msk [vmem:[#allocation2 + $0xf] sm:$0x1f] %vm39_vm2, %v111_v54 }
  0x8e   :  { %120 = vst.msk [vmem:[#allocation2 + $0xf] sm:$0x1f] %vm47_vm3, %v118_v48  ;;  %v142_v0 = vpop.permute.xlu2 %141  ;;  %v673_v48 = vld [vmem:[%s1349_s3 + $0x88] sm:$0xff] }
  0x8f   :  { %96 = vst.msk [vmem:[#allocation2 + $0xa] sm:$0x1f] %vm47_vm3, %v94_v55  ;;  %712 = vmatpush.msrb.mxu2 %v673_v48  ;;  %v510_v55 = vld [vmem:[#allocation3 + $0x31] ss:$2 sm:$0x3]  ;;  %v670_v48 = vld [vmem:[%s1349_s3 + $0x70] sm:$0xff] }
  0x90   :  { %v512_v56 = vrot.slane %v510_v55, 4  ;;  %679 = vmatpush.msra.mxu1 %v670_v48  ;;  %v665_v55 = vld [vmem:[%s1349_s3 + $0x48] sm:$0xff] }
  0x91   :  { %713 = vmatpush.msrb.mxu2 %v672_v49  ;;  %v669_v49 = vld [vmem:[%s1349_s3 + $0x68] sm:$0xff] }
  0x92   :  { %515 = vst.msk [vmem:[#allocation4] sm:$0x30] %vm514_vm14, %v512_v56  ;;  %680 = vmatpush.msra.mxu1 %v669_v49  ;;  %v664_v56 = vld [vmem:[%s1349_s3 + $0x40] sm:$0xff]  ;;  %v747_v49 = vperm.slane %v1210_v28, 2 }
  0x94   :  { %v176_v57 = vpop.permute.xlu0 %175  ;;  %v200_v59 = vpop.permute.xlu1 %199 }
  0x95   :  { %178 = vst.msk [vmem:[#allocation2 + $0x1e] sm:$0x1f] %vm31_vm1, %v176_v57 }
  0x96   :  { %185 = vst.msk [vmem:[#allocation2 + $0x1e] sm:$0x1f] %vm39_vm2, %v183_v53  ;;  %v266_v60 = vld [vmem:[#allocation2 + $0x8] sm:$0xff]  ;;  %v231_v4 = vpop.permute.xlu2 %230 }
  0x97   :  { %202 = vst.msk [vmem:[#allocation2 + $0x23] sm:$0x1f] %vm31_vm1, %v200_v59  ;;  %875 = vmatmul.msk.f32.gmra.mxu0 %vm277_vm4, %v266_v60 }
  0x9c   :  { %v207_v62 = vpop.permute.xlu0 %206  ;;  %v190_v63 = vpop.permute.xlu1 %189 }
  0x9d   :  { %209 = vst.msk [vmem:[#allocation2 + $0x23] sm:$0x1f] %vm39_vm2, %v207_v62 }
  0x9e   :  { %216 = vst.msk [vmem:[#allocation2 + $0x23] sm:$0x1f] %vm47_vm3, %v214_v58  ;;  %v262_v11 = vpop.permute.xlu2 %261 }
  0x9f   :  { %192 = vst.msk [vmem:[#allocation2 + $0x1e] sm:$0x1f] %vm47_vm3, %v190_v63 }
  0xa4   :  { %v128_v1 = vpop.permute.xlu0 %127  ;;  %v135_v2 = vpop.permute.xlu1 %134 }
  0xa5   :  { %130 = vst.msk [vmem:[#allocation2 + $0x14] sm:$0x1f] %vm31_vm1, %v128_v1  ;;  %v378_v1 = vld [vmem:[#allocation3] ss:$2 sm:$0x3] }
  0xa6   :  { %137 = vst.msk [vmem:[#allocation2 + $0x14] sm:$0x1f] %vm39_vm2, %v135_v2  ;;  %v269_v3 = vld [vmem:[#allocation2 + $0x20] sm:$0xff]  ;;  %v166_v17 = vpop.permute.xlu2 %165 }
  0xa7   :  { %144 = vst.msk [vmem:[#allocation2 + $0x14] sm:$0x1f] %vm47_vm3, %v142_v0  ;;  %878 = vmatmul.msk.f32.vlgmr.msra.gmra.mxu2 %vm277_vm4, %v269_v3 }
  0xa8   :  { %379 = vst.msk [vmem:[#allocation4] sm:$0x3] %vm350_vm6, %v378_v1  ;;  %v659_v1 = vld [vmem:[%s1349_s3 + $0x18] sm:$0xff] }
  0xac   :  { %v224_v6 = vpop.permute.xlu0 %223  ;;  %v248_v7 = vpop.permute.xlu1 %247 }
  0xad   :  { %226 = vst.msk [vmem:[#allocation2 + $0x28] sm:$0x1f] %vm31_vm1, %v224_v6 }
  0xae   :  { %233 = vst.msk [vmem:[#allocation2 + $0x28] sm:$0x1f] %vm39_vm2, %v231_v4  ;;  %v267_v8 = vld [vmem:[#allocation2 + $0x10] sm:$0xff]  ;;  %v521_v57 = vpop.permute.xlu2 %520 }
  0xaf   :  { %250 = vst.msk [vmem:[#allocation2 + $0x2d] sm:$0x1f] %vm31_vm1, %v248_v7  ;;  %876 = vmatmul.msk.f32.gmra.mxu0 %vm277_vm4, %v267_v8 }
  0xb0   :  { %524 = vst.msk [vmem:[#allocation4] sm:$0x30] %vm523_vm13, %v521_v57  ;;  %vm492_vm13 = vcmask 913154  }
  0xb4   :  { %v255_v12 = vpop.permute.xlu0 %254  ;;  %v238_v13 = vpop.permute.xlu1 %237 }
  0xb5   :  { %257 = vst.msk [vmem:[#allocation2 + $0x2d] sm:$0x1f] %vm39_vm2, %v255_v12 }
  0xb6   :  { %264 = vst.msk [vmem:[#allocation2 + $0x2d] sm:$0x1f] %vm47_vm3, %v262_v11  ;;  %v1254_v27 = vpop.permute.xlu2 %634 }
  0xb7   :  { %240 = vst.msk [vmem:[#allocation2 + $0x28] sm:$0x1f] %vm47_vm3, %v238_v13 }
  0xbc   :  { %v152_v16 = vpop.permute.xlu0 %151  ;;  %v159_v18 = vpop.permute.xlu1 %158 }
  0xbd   :  { %154 = vst.msk [vmem:[#allocation2 + $0x19] sm:$0x1f] %vm31_vm1, %v152_v16  ;;  %v271_v20 = vld [vmem:[#allocation2 + $0x30] sm:$0x3]  ;;  %vm532_vm1 = vcmask 390404  }
  0xbe   :  { %161 = vst.msk [vmem:[#allocation2 + $0x19] sm:$0x1f] %vm39_vm2, %v159_v18  ;;  %v270_v19 = vld [vmem:[#allocation2 + $0x28] sm:$0xff]  ;;  %vm402_vm2 = vcmask 517504  }
  0xbf   :  { %168 = vst.msk [vmem:[#allocation2 + $0x19] sm:$0x1f] %vm47_vm3, %v166_v17  ;;  %879 = vmatmul.msk.f32.gmra.mxu2 %vm277_vm4, %v270_v19  ;;  %vm410_vm3 = vcmask 648704  }
  0xc4   :  { %v384_v2 = vpop.permute.xlu0 %383  ;;  %v392_v8 = vpop.permute.xlu1 %391 }
  0xc5   :  { %387 = vst.msk [vmem:[#allocation4] sm:$0x3] %vm386_vm15, %v384_v2  ;;  %vm550_vm15 = vcmask 652804  }
  0xc6   :  { %v268_v21 = vld [vmem:[#allocation2 + $0x18] sm:$0xff]  ;;  %395 = vst.msk [vmem:[#allocation4] sm:$0x3] %vm394_vm0, %v392_v8  ;;  %vm559_vm0 = vcmask 784004  }
  0xc7   :  { %880 = vmatmul.msk.f32.gmra.mxu2 %vm277_vm4, %v271_v20  ;;  %877 = vmatmul.msk.f32.gmra.mxu0 %vm277_vm4, %v268_v21 }
  0xcc   :  { %v530_v25 = vpop.permute.xlu0 %529 }
  0xcd   :  { %533 = vst.msk [vmem:[#allocation4] sm:$0x30] %vm532_vm1, %v530_v25  ;;  %vm568_vm1 = vcmask 915204  }
  0xd4   :  { %v1263_v42 = vpop.permute.xlu0 %489 }
 0x104   :  { %v316_v30 = vpop.f32.mrf.mxu0 }
 0x105   :  { %v317_v31 = vadd.f32 %v316_v30, %v1213_v29 }
 0x107   :  { %355 = vst.msk [vmem:[#allocation3 + $0xa] sm:$0xe0] %vm354_vm8, %v317_v31  ;;  %vm459_vm8 = vcmask 388354  }
 0x10e   :  { %v397_v32 = vld [vmem:[#allocation3 + $0xe] ss:$2 sm:$0x3] }
 0x10f   :  { %399 = vrot.lane.b32.xlu2 %v397_v32, %s942_s17  ;;  %v439_v33 = vld [vmem:[#allocation3 + $0xe] ss:$2 sm:$0x3] }
 0x110   :  { %v441_v34 = vrot.slane %v439_v33, 6 }
 0x112   :  { %444 = vst.msk [vmem:[#allocation4] sm:$0xc] %vm443_vm9, %v441_v34  ;;  %vm434_vm9 = vcmask 1042304  }
 0x114   :  { %v319_v35 = vpop.f32.mrf.mxu0 }
 0x115   :  { %v320_v36 = vadd.f32 %v319_v35, %v1213_v29  ;;  %v495_v35 = vld [vmem:[#allocation3 + $0x2c] ss:$2 sm:$0x3] }
 0x117   :  { %356 = vst.msk [vmem:[#allocation3 + $0x12] sm:$0x3] %vm350_vm6, %v320_v36  ;;  %v640_v36 = vld [vmem:[#allocation3 + $0x5d] ss:$2 sm:$0x3] }
 0x11e   :  { %v405_v37 = vld [vmem:[#allocation3 + $0x10] ss:$2 sm:$0x3] }
 0x11f   :  { %v453_v38 = vld [vmem:[#allocation3 + $0x12] ss:$2 sm:$0x3]  ;;  %407 = vrot.lane.b32.xlu0 %v405_v37, %s943_s1 }
 0x120   :  { %v455_v39 = vrot.slane %v453_v38, 6  ;;  %v413_v58 = vld [vmem:[#allocation3 + $0x12] ss:$2 sm:$0x3]  ;;  %v497_v38 = vrot.slane %v495_v35, 6 }
 0x121   :  { %v445_v60 = vld [vmem:[#allocation3 + $0x10] ss:$2 sm:$0x3] }
 0x122   :  { %456 = vrot.lane.b32.xlu2 %v455_v39, %s940_s0  ;;  %v447_v0 = vrot.slane %v445_v60, 6  ;;  %v642_v39 = vrot.slane %v640_v36, 2  ;;  %v754_v36 = vld [vmem:[%s1350_s4 + $0x18] sm:$0xff] }
 0x123   :  { %771 = vmatpush.msra.mxu3 %v754_v36 }
 0x12a   :  { %v328_v41 = vpop.f32.mrf.mxu2 }
 0x12b   :  { %v329_v43 = vadd.f32 %v328_v41, %v1213_v29 }
 0x12c   :  { %v322_v44 = vpop.f32.mrf.mxu0 }
 0x12d   :  { %372 = vst.msk [vmem:[#allocation3 + $0x42] sm:$0x7] %vm371_vm10, %v329_v43  ;;  %v323_v45 = vadd.f32 %v322_v44, %v1213_v29  ;;  %vm467_vm10 = vcmask 519554  }
 0x12f   :  { %362 = vst.msk [vmem:[#allocation3 + $0x1e] sm:$0xf] %vm361_vm12, %v323_v45  ;;  %vm483_vm12 = vcmask 781954  }
 0x134   :  { %v598_v50 = vld [vmem:[#allocation3 + $0x43] ss:$2 sm:$0x3] }
 0x135   :  { %v553_v51 = vld [vmem:[#allocation3 + $0x43] ss:$2 sm:$0x3]  ;;  %v600_v52 = vrot.slane %v598_v50, 2  ;;  %v668_v50 = vld [vmem:[%s1349_s3 + $0x60] sm:$0xff] }
 0x136   :  { %v555_v53 = vrot.slane %v553_v51, 4  ;;  %v437_v54 = vld [vmem:[#allocation3 + $0x20] ss:$2 sm:$0x3]  ;;  %681 = vmatpush.msra.mxu1 %v668_v50 }
 0x137   :  { %601 = vrot.lane.b32.xlu1 %v600_v52, %s940_s0  ;;  %438 = vst.msk [vmem:[#allocation4 + $0x8] sm:$0x3] %vm350_vm6, %v437_v54  ;;  %v429_v16 = vld [vmem:[#allocation3 + $0x1e] ss:$2 sm:$0x3]  ;;  %vm426_vm6 = vcmask 911104  }
 0x138   :  { %556 = vrot.lane.b32.xlu0 %v555_v53, %s944_s22  ;;  %v421_v19 = vld [vmem:[#allocation3 + $0x1c] ss:$2 sm:$0x3]  ;;  %v477_v22 = vld [vmem:[#allocation3 + $0x20] ss:$2 sm:$0x3] }
 0x139   :  { %v469_v20 = vld [vmem:[#allocation3 + $0x1e] ss:$2 sm:$0x3]  ;;  %v479_v26 = vrot.slane %v477_v22, 6 }
 0x13a   :  { %v461_v21 = vld [vmem:[#allocation3 + $0x1c] ss:$2 sm:$0x3]  ;;  %v471_v23 = vrot.slane %v469_v20, 6  ;;  %v667_v53 = vld [vmem:[%s1349_s3 + $0x58] sm:$0xff] }
 0x13b   :  { %v463_v24 = vrot.slane %v461_v21, 6  ;;  %v666_v54 = vld [vmem:[%s1349_s3 + $0x50] sm:$0xff]  ;;  %682 = vmatpush.msra.mxu1 %v667_v53 }
 0x13d   :  { %683 = vmatpush.msra.mxu1 %v666_v54 }
 0x13f   :  { %415 = vrot.lane.b32.xlu1 %v413_v58, %s944_s22  ;;  %684 = vmatpush.msra.mxu1 %v665_v55  ;;  %v755_v55 = vperm.slane %v1210_v28, 4 }
 0x141   :  { %685 = vmatpush.msra.mxu1 %v664_v56 }
 0x142   :  { %v331_v59 = vpop.f32.mrf.mxu2 }
 0x143   :  { %v332_v61 = vadd.f32 %v331_v59, %v1213_v29 }
 0x144   :  { %v325_v62 = vpop.f32.mrf.mxu0 }
 0x145   :  { %375 = vst.msk [vmem:[#allocation3 + $0x4e] sm:$0x1f] %vm352_vm7, %v332_v61  ;;  %v326_v63 = vadd.f32 %v325_v62, %v1213_v29  ;;  %vm451_vm7 = vcmask 257154   ;;  %v663_v61 = vld [vmem:[%s1349_s3 + $0x38] sm:$0xff]  ;;  %v662_v62 = vld [vmem:[%s1349_s3 + $0x30] sm:$0xff] }
 0x146   :  { %686 = vmatpush.msra.mxu1 %v663_v61 }
 0x147   :  { %448 = vrot.lane.b32.xlu1 %v447_v0, %s937_s23  ;;  %370 = vst.msk [vmem:[#allocation3 + $0x3a] sm:$0xc0] %vm369_vm11, %v326_v63  ;;  %v661_v63 = vld [vmem:[%s1349_s3 + $0x28] sm:$0xff]  ;;  %v660_v0 = vld [vmem:[%s1349_s3 + $0x20] sm:$0xff] }
 0x148   :  { %687 = vmatpush.msra.mxu1 %v662_v62 }
 0x14a   :  { %v334_v3 = vpop.f32.mrf.mxu2  ;;  %688 = vmatpush.msra.mxu1 %v661_v63 }
 0x14c   :  { %v622_v4 = vld [vmem:[#allocation3 + $0x51] ss:$2 sm:$0x3]  ;;  %v606_v9 = vld [vmem:[#allocation3 + $0x4d] ss:$2 sm:$0x3]  ;;  %689 = vmatpush.msra.mxu1 %v660_v0 }
 0x14d   :  { %v614_v5 = vld [vmem:[#allocation3 + $0x4f] ss:$2 sm:$0x3]  ;;  %v624_v6 = vrot.slane %v622_v4, 2  ;;  %v608_v11 = vrot.slane %v606_v9, 2 }
 0x14e   :  { %v616_v7 = vrot.slane %v614_v5, 2  ;;  %v580_v10 = vld [vmem:[#allocation3 + $0x51] ss:$2 sm:$0x3]  ;;  %v658_v5 = vld [vmem:[%s1349_s3 + $0x10] sm:$0xff]  ;;  %690 = vmatpush.msra.mxu1 %v659_v1 }
 0x14f   :  { %625 = vrot.lane.b32.xlu1 %v624_v6, %s944_s22  ;;  %v582_v12 = vrot.slane %v580_v10, 4  ;;  %609 = vrot.lane.b32.xlu2 %v608_v11, %s942_s17  ;;  %v562_v13 = vld [vmem:[#allocation3 + $0x4d] ss:$2 sm:$0x3]  ;;  %v657_v6 = vld [vmem:[%s1349_s3 + $0x8] sm:$0xff] }
 0x150   :  { %617 = vrot.lane.b32.xlu0 %v616_v7, %s943_s1  ;;  %v564_v14 = vrot.slane %v562_v13, 4  ;;  %v585_v15 = vld [vmem:[#allocation3 + $0x3f] ss:$2 sm:$0x3]  ;;  %691 = vmatpush.msra.mxu1 %v658_v5  ;;  %v656_v7 = vld [vmem:[%s1349_s3] sm:$0xff] }
 0x151   :  { %584 = vst.msk [vmem:[#allocation4 + $0x8] sm:$0x30] %vm514_vm14, %v582_v12  ;;  %v587_v17 = vrot.slane %v585_v15, 2  ;;  %v535_v29 = vld [vmem:[#allocation3 + $0x3f] ss:$2 sm:$0x3] }
 0x152   :  { %v590_v30 = vld [vmem:[#allocation3 + $0x41] ss:$2 sm:$0x3]  ;;  %v537_v32 = vrot.slane %v535_v29, 4  ;;  %692 = vmatpush.msra.mxu1 %v657_v6  ;;  %vm541_vm14 = vcmask 521604  }
 0x153   :  { %589 = vst.msk [vmem:[#allocation4] sm:$0xc0] %vm369_vm11, %v587_v17  ;;  %v544_v31 = vld [vmem:[#allocation3 + $0x41] ss:$2 sm:$0x3]  ;;  %v592_v33 = vrot.slane %v590_v30, 2 }
 0x154   :  { %v546_v34 = vrot.slane %v544_v31, 4  ;;  %v571_v40 = vld [vmem:[#allocation3 + $0x4f] ss:$2 sm:$0x3]  ;;  %vm475_vm11 = vcmask 650754   ;;  %693 = vmatpush.msra.mxu1 %v656_v7  ;;  %v674_v17 = vperm.slane %v1210_v28, 1 }
 0x155   :  { %v573_v41 = vrot.slane %v571_v40, 4 }
 0x157   :  { %565 = vrot.lane.b32.xlu1 %v564_v14, %s941_s15  ;;  %423 = vrot.lane.b32.xlu2 %v421_v19, %s941_s15 }
 0x158   :  { %431 = vrot.lane.b32.xlu0 %v429_v16, %s945_s24  ;;  %v655_v18 = vld [vmem:[#allocation4 + $0x8] sm:$0xff] }
 0x159   :  { %881 = vmatmul.msk.f32.vlgmr.msrb.gmra.mxu2 %vm337_vm5, %v655_v18  ;;  %vm418_vm5 = vcmask 779904  }
 0x15f   :  { %472 = vrot.lane.b32.xlu1 %v471_v23, %s943_s1  ;;  %480 = vrot.lane.b32.xlu2 %v479_v26, %s944_s22  ;;  %v946_v23 = vmov 32.0  }
 0x160   :  { %464 = vrot.lane.b32.xlu0 %v463_v24, %s942_s17  ;;  %900 = vrcp.f32 %v946_v23 }
 0x166   :  { %v901_v24 = vpop.eup %900 }
 0x167   :  { %538 = vrot.lane.b32.xlu1 %v537_v32, %s942_s17  ;;  %547 = vrot.lane.b32.xlu2 %v546_v34, %s943_s1  ;;  %v722_v25 = vmul.f32 32.0, %v901_v24 }
 0x168   :  { %593 = vrot.lane.b32.xlu0 %v592_v33, %s937_s23 }
 0x169   :  { %v400_v37 = vpop.permute.xlu2 %399  ;;  %v723_v26 = vsub.f32 1.0, %v722_v25 }
 0x16a   :  { %403 = vst.msk [vmem:[#allocation4] sm:$0x3] %vm402_vm2, %v400_v37  ;;  %vm577_vm2 = vcmask 1046404   ;;  %v753_v37 = vld [vmem:[%s1350_s4 + $0x10] sm:$0xff] }
 0x16b   :  { %v724_v29 = vmul.f32 %v901_v24, %v723_v26  ;;  %772 = vmatpush.msra.mxu3 %v753_v37 }
 0x16d   :  { %v725_v30 = vadd.f32 %v901_v24, %v724_v29 }
 0x16f   :  { %498 = vrot.lane.b32.xlu1 %v497_v38, %s945_s24  ;;  %574 = vrot.lane.b32.xlu2 %v573_v41, %s945_s24  ;;  %v752_v38 = vld [vmem:[%s1350_s4 + $0x8] sm:$0xff] }
 0x170   :  { %643 = vrot.lane.b32.xlu0 %v642_v39, %s945_s24  ;;  %v751_v39 = vld [vmem:[%s1350_s4] sm:$0xff]  ;;  %773 = vmatpush.msra.mxu3 %v752_v38  ;;  %s948_s4 = smov [#allocation5]  }
 0x171   :  { %s824_s10 = sshll.u32 %s948_s4, 4  ;;  %s825_s10 = int_to_ptr.vmem [resolvable:$true] %s824_s10 }
 0x172   :  { %774 = vmatpush.msra.mxu3 %v751_v39 }
 0x17c   :  { %v457_v44 = vpop.permute.xlu2 %456 }
 0x191   :  { %v408_v43 = vpop.permute.xlu0 %407 }
 0x192   :  { %411 = vst.msk [vmem:[#allocation4] sm:$0x3] %vm410_vm3, %v408_v43  ;;  %vm596_vm3 = vcmask 261254  }
 0x1a9   :  { %v1265_v45 = vpop.permute.xlu1 %601  ;;  %v1267_v46 = vpop.permute.xlu2 %609 }
 0x1aa   :  { %v557_v57 = vpop.permute.xlu0 %556 }
 0x1b1   :  { %v416_v51 = vpop.permute.xlu1 %415  ;;  %v424_v52 = vpop.permute.xlu2 %423 }
 0x1b2   :  { %419 = vst.msk [vmem:[#allocation4] sm:$0x3] %vm418_vm5, %v416_v51  ;;  %vm604_vm5 = vcmask 392454  }
 0x1b3   :  { %427 = vst.msk [vmem:[#allocation4] sm:$0x3] %vm426_vm6, %v424_v52  ;;  %vm612_vm6 = vcmask 523654   ;;  %v749_v52 = vperm.slane %v1210_v28, 3 }
 0x1b9   :  { %v449_v58 = vpop.permute.xlu1 %448  ;;  %v481_v2 = vpop.permute.xlu2 %480 }
 0x1ba   :  { %452 = vst.msk [vmem:[#allocation4] sm:$0xc] %vm451_vm7, %v449_v58  ;;  %vm501_vm7 = vcmask 1044354  }
 0x1bb   :  { %460 = vst.msk [vmem:[#allocation4] sm:$0xc] %vm459_vm8, %v457_v44  ;;  %vm620_vm8 = vcmask 654854  }
 0x1c1   :  { %v626_v59 = vpop.permute.xlu1 %625  ;;  %v548_v10 = vpop.permute.xlu2 %547 }
 0x1c2   :  { %v618_v60 = vpop.permute.xlu0 %617 }
 0x1c9   :  { %v566_v3 = vpop.permute.xlu1 %565  ;;  %v575_v13 = vpop.permute.xlu2 %574 }
 0x1ca   :  { %v432_v4 = vpop.permute.xlu0 %431 }
 0x1cb   :  { %435 = vst.msk [vmem:[#allocation4] sm:$0x3] %vm434_vm9, %v432_v4  ;;  %vm628_vm9 = vcmask 786054  }
 0x1d1   :  { %v473_v8 = vpop.permute.xlu1 %472 }
 0x1d2   :  { %v465_v9 = vpop.permute.xlu0 %464 }
 0x1d3   :  { %468 = vst.msk [vmem:[#allocation4] sm:$0xc] %vm467_vm10, %v465_v9  ;;  %vm637_vm10 = vcmask 917254  }
 0x1d4   :  { %476 = vst.msk [vmem:[#allocation4] sm:$0xc] %vm475_vm11, %v473_v8  ;;  %vm646_vm11 = vcmask 1048454  }
 0x1d5   :  { %484 = vst.msk [vmem:[#allocation4] sm:$0xc] %vm483_vm12, %v481_v2  ;;  %vm726_vm12 = vweird.f32 %v901_v24 }
 0x1d6   :  { %493 = vst.msk [vmem:[#allocation4] sm:$0xc] %vm492_vm13, %v1263_v42 }
 0x1d9   :  { %v539_v11 = vpop.permute.xlu1 %538 }
 0x1da   :  { %v594_v12 = vpop.permute.xlu0 %593  ;;  %542 = vst.msk [vmem:[#allocation4] sm:$0x30] %vm541_vm14, %v539_v11 }
 0x1db   :  { %551 = vst.msk [vmem:[#allocation4] sm:$0x30] %vm550_vm15, %v548_v10 }
 0x1dc   :  { %560 = vst.msk [vmem:[#allocation4] sm:$0x30] %vm559_vm0, %v557_v57  ;;  %v715_v20 = vpop.f32.mrf.mxu2  ;;  %vm779_vm0 = vcmask 523264  }
 0x1dd   :  { %569 = vst.msk [vmem:[#allocation4] sm:$0x30] %vm568_vm1, %v566_v3 }
 0x1de   :  { %578 = vst.msk [vmem:[#allocation4] sm:$0x30] %vm577_vm2, %v575_v13 }
 0x1df   :  { %597 = vst.msk [vmem:[#allocation4] sm:$0xc0] %vm596_vm3, %v594_v12 }
 0x1e0   :  { %605 = vst.msk [vmem:[#allocation4] sm:$0xc0] %vm604_vm5, %v1265_v45 }
 0x1e1   :  { %613 = vst.msk [vmem:[#allocation4] sm:$0xc0] %vm612_vm6, %v1267_v46  ;;  %v499_v14 = vpop.permute.xlu1 %498 }
 0x1e2   :  { %502 = vst.msk [vmem:[#allocation4] sm:$0xc] %vm501_vm7, %v499_v14  ;;  %v644_v15 = vpop.permute.xlu0 %643 }
 0x1e3   :  { %621 = vst.msk [vmem:[#allocation4] sm:$0xc0] %vm620_vm8, %v618_v60 }
 0x1e4   :  { %629 = vst.msk [vmem:[#allocation4] sm:$0xc0] %vm628_vm9, %v626_v59  ;;  %v947_v59 = vmov 64.0  }
 0x1e5   :  { %638 = vst.msk [vmem:[#allocation4] sm:$0xc0] %vm637_vm10, %v1254_v27  ;;  %v727_v27 = vsel %vm726_vm12, %v901_v24, %v725_v30 }
 0x1e6   :  { %647 = vst.msk [vmem:[#allocation4] sm:$0xc0] %vm646_vm11, %v644_v15 }
 0x1ed   :  { %v654_v16 = vld [vmem:[#allocation4] sm:$0xff] }
 0x1ee   :  { %694 = vmatmul.f32.vlgmr.msra.gmra.mxu1 %v654_v16 }
 0x26b   :  { %v695_v18 = vpop.f32.mrf.mxu1 }
 0x26c   :  { %v696_v19 = vadd.f32 %v695_v18, %v674_v17 }
 0x26e   :  { %v716_v21 = vadd.f32 %v715_v20, %v696_v19 }
 0x270   :  { %v718_v22 = vsel %vm277_vm4, %v716_v21, 0.0 }
 0x271   :  { %719 = vadd.xlane.f32.xlu1 %v718_v22 }
 0x2e4   :  { %v720_v31 = vpop.xlane.xlu1 %719 }
 0x2e5   :  { %v728_v32 = vmul.f32 %v727_v27, %v720_v31 }
 0x2e7   :  { %v729_v33 = vsub.f32 %v716_v21, %v728_v32 }
 0x2e9   :  { %v730_v34 = vmul.f32 %v729_v33, %v729_v33 }
 0x2eb   :  { %v731_v35 = vsel %vm277_vm4, %v730_v34, 0.0 }
 0x2ec   :  { %732 = vadd.xlane.f32.xlu2 %v731_v35 }
 0x35f   :  { %v733_v40 = vpop.xlane.xlu2 %732 }
 0x360   :  { %v734_v41 = vmul.f32 %v733_v40, %v727_v27 }
 0x362   :  { %v735_v42 = vadd.f32 1e-05, %v734_v41 }
 0x364   :  { %902 = vrsqrt.f32 %v735_v42  ;;  %vm742_vm14 = vweird.f32 %v735_v42 }
 0x365   :  { %904 = vrcp.f32 %v947_v59 }
 0x36a   :  { %v903_v43 = vpop.eup %902 }
 0x36b   :  { %v737_v44 = vmul.f32 %v903_v43, %v735_v42  ;;  %vm743_vm13 = vweird.f32 %v903_v43  ;;  %v905_v60 = vpop.eup %904 }
 0x36c   :  { %vm744_vm15 = vmor %vm742_vm14, %vm743_vm13  ;;  %v784_v61 = vmul.f32 64.0, %v905_v60  ;;  %vm788_vm1 = vweird.f32 %v905_v60 }
 0x36d   :  { %v738_v45 = vmul.f32 %v903_v43, %v737_v44 }
 0x36e   :  { %v785_v62 = vsub.f32 1.0, %v784_v61 }
 0x36f   :  { %v739_v46 = vmul.f32 0.5, %v738_v45 }
 0x370   :  { %v786_v63 = vmul.f32 %v905_v60, %v785_v62 }
 0x371   :  { %v740_v47 = vsub.f32 1.5, %v739_v46 }
 0x372   :  { %v787_v0 = vadd.f32 %v905_v60, %v786_v63 }
 0x373   :  { %v741_v48 = vmul.f32 %v903_v43, %v740_v47 }
 0x374   :  { %v789_v1 = vsel %vm788_vm1, %v905_v60, %v787_v0 }
 0x375   :  { %v745_v50 = vsel %vm744_vm15, %v903_v43, %v741_v48 }
 0x376   :  { %v746_v51 = vmul.f32 %v745_v50, %v729_v33 }
 0x378   :  { %v748_v53 = vmul.f32 %v747_v49, %v746_v51 }
 0x37a   :  { %v750_v54 = vadd.f32 %v749_v52, %v748_v53 }
 0x37c   :  { %882 = vmatmul.msk.f32.vlgmr.msra.gmra.mxu3 %vm277_vm4, %v750_v54 }
 0x3ff   :  { %v776_v56 = vpop.f32.mrf.mxu3 }
 0x400   :  { %v777_v57 = vadd.f32 %v776_v56, %v755_v55 }
 0x402   :  { %v780_v58 = vsel %vm779_vm0, %v777_v57, 0.0 }
 0x403   :  { %781 = vadd.xlane.f32.xlu0 %v780_v58 }
 0x476   :  { %v782_v2 = vpop.xlane.xlu0 %781 }
 0x477   :  { %v790_v3 = vmul.f32 %v789_v1, %v782_v2 }
 0x479   :  { %v791_v4 = vsub.f32 %v777_v57, %v790_v3 }
 0x47b   :  { %v792_v5 = vmul.f32 %v791_v4, %v791_v4 }
 0x47d   :  { %v793_v28 = vsel %vm779_vm0, %v792_v5, 0.0 }
 0x47e   :  { %794 = vadd.xlane.f32.xlu2 %v793_v28 }
 0x4f1   :  { %v795_v6 = vpop.xlane.xlu2 %794 }
 0x4f2   :  { %v796_v7 = vmul.f32 %v795_v6, %v789_v1 }
 0x4f4   :  { %v797_v8 = vadd.f32 1e-05, %v796_v7 }
 0x4f6   :  { %906 = vrsqrt.f32 %v797_v8  ;;  %vm804_vm2 = vweird.f32 %v797_v8 }
 0x4fc   :  { %v907_v9 = vpop.eup %906 }
 0x4fd   :  { %v799_v10 = vmul.f32 %v907_v9, %v797_v8  ;;  %vm805_vm4 = vweird.f32 %v907_v9 }
 0x4fe   :  { %vm806_vm3 = vmor %vm804_vm2, %vm805_vm4 }
 0x4ff   :  { %v800_v11 = vmul.f32 %v907_v9, %v799_v10 }
 0x501   :  { %v801_v12 = vmul.f32 0.5, %v800_v11 }
 0x503   :  { %v802_v13 = vsub.f32 1.5, %v801_v12 }
 0x505   :  { %v803_v14 = vmul.f32 %v907_v9, %v802_v13 }
 0x507   :  { %v807_v15 = vsel %vm806_vm3, %v907_v9, %v803_v14 }
 0x508   :  { %v808_v16 = vmul.f32 %v807_v15, %v791_v4 }
 0x50a   :  { %v810_v17 = vmul.f32 %v808_v16, %v808_v16  ;;  %v809_v22 = vmul.f32 0.5, %v808_v16 }
 0x50c   :  { %v811_v18 = vmul.f32 %v810_v17, %v808_v16 }
 0x50e   :  { %v812_v19 = vmul.f32 0.044715, %v811_v18 }
 0x510   :  { %v813_v20 = vadd.f32 %v812_v19, %v808_v16 }
 0x512   :  { %v814_v21 = vmul.f32 0.7978846, %v813_v20 }
 0x514   :  { %908 = vtanh.f32 %v814_v21 }
 0x51a   :  { %v909_v23 = vpop.eup %908 }
 0x51b   :  { %v816_v24 = vmul.f32 %v909_v23, %v809_v22 }
 0x51d   :  { %v817_v25 = vsel %vm779_vm0, %v816_v24, 0.0 }
 0x51e   :  { %818 = vst [vmem:[#allocation5] sm:$0xff] %v817_v25 }
 0x51f   :  { %829 = dma.vmem_to_hbm [thread:$0]  %s825_s10, 128, %s827_s13, [#allocation6]  }
 0x520   :  { %934 = dma.done.wait [#allocation6], 128  }
 0x521   :  { %935 = vsyncadd [#allocation6], 4294967168 }
 0x522   :  { %834 = vsyncpa [#allocation6], 1 }

</bundles_post_ra>
